<compile_context>
chip_gen: v6e
topology: v6e:2x2x1
jax: 0.10.0
libtpu: 0.0.40
codegen_flags: <defaults>
</compile_context>

<pallas_src>
import functools

import jax
import jax.numpy as jnp
from jax.experimental import pallas as pl
from jax.experimental.pallas import tpu as pltpu


def _round_up(n, m):
    return ((n + m - 1) // m) * m


def _dueling_kernel(
    x_ref,                 # (TB, S)            f32  : state tile (cast to bf16 in-kernel)
    w1_ref, b1_ref,        # (S, 1536) bf16 / (1, 1536) f32   fused [aw1 | vw1]
    aw2_ref, ab2_ref,      # (1024, 512) bf16 / (1, 512) f32
    vw2_ref, vb2_ref,      # (512, 512)  bf16 / (1, 512) f32
    w3_ref, b3_ref,        # (1024, AP)  bf16 / (1, AP)  f32   fused [aw3 ; vw3], ab3+vb3
    q_ref,                 # (TB, AP) f32 : val + adv (global mean subtracted in wrapper)
    a2sum_ref,             # (8, 512) f32 : this tile's masked row-sum of a2 (broadcast)
    *, batch_valid, tile_b, mask_rows,
):
    x = x_ref[...].astype(jnp.bfloat16)

    # ---- fused layer 1 (both streams share x): one (TB,S)x(S,1536) matmul ----
    h1 = jnp.dot(x, w1_ref[...], preferred_element_type=jnp.float32) + b1_ref[...]
    h1 = jnp.maximum(h1, 0.0).astype(jnp.bfloat16)
    a1 = h1[:, :1024]      # advantage-stream hidden (lane-aligned slice)
    v1 = h1[:, 1024:]      # value-stream hidden

    # ---- layer 2, both streams ----
    a2 = jnp.dot(a1, aw2_ref[...], preferred_element_type=jnp.float32) + ab2_ref[...]
    a2 = jnp.maximum(a2, 0.0).astype(jnp.bfloat16)
    v2 = jnp.dot(v1, vw2_ref[...], preferred_element_type=jnp.float32) + vb2_ref[...]
    v2 = jnp.maximum(v2, 0.0).astype(jnp.bfloat16)

    # ---- fused head: one MXU call computes val + adv directly ----
    h2 = jnp.concatenate([a2, v2], axis=-1)                    # (TB, 1024) bf16
    q_ref[...] = jnp.dot(h2, w3_ref[...],
                         preferred_element_type=jnp.float32) + b3_ref[...]

    # ---- masked row-sum of a2 for the GLOBAL adv mean (finished in wrapper) ----
    a2f = a2.astype(jnp.float32)
    if mask_rows:
        i = pl.program_id(0)
        row = i * tile_b + jax.lax.broadcasted_iota(jnp.int32, a2f.shape, 0)
        a2f = jnp.where(row < batch_valid, a2f, 0.0)
    rowsum = jnp.sum(a2f, axis=0, keepdims=True)               # (1, 512) f32, sublane reduce
    a2sum_ref[...] = jnp.broadcast_to(rowsum, a2sum_ref.shape)


@functools.partial(jax.jit, static_argnames=("action_size",))
def dueling_q_forward(x, prep, *, action_size):
    """x: (B, state_size) f32.  prep: output of prepare_params.  -> (B, action_size) f32."""
    B, S = x.shape
    AP = prep["w3"].shape[1]

    # Adaptive batch tile: single rounded tile at small B, 256/512 rows at large B.
    if B <= 128:
        tile_b = _round_up(B, 8)
    elif B < 512:
        tile_b = 256
    else:
        tile_b = 512
    num_tiles = pl.cdiv(B, tile_b)
    Bp = num_tiles * tile_b
    mask_rows = Bp != B

    xp = x if not mask_rows else jnp.pad(x, ((0, Bp - B), (0, 0)))

    operands = (
        xp,
        prep["w1"], prep["b1"],
        prep["aw2"], prep["ab2"],
        prep["vw2"], prep["vb2"],
        prep["w3"], prep["b3"],
    )

    def pinned(arr):
        # Whole array as one VMEM block, constant block index -> fetched once and
        # resident across all batch tiles.
        return pl.BlockSpec(arr.shape, lambda i: (0, 0))

    in_specs = [pl.BlockSpec((tile_b, S), lambda i: (i, 0))] + [
        pinned(a) for a in operands[1:]
    ]
    out_specs = (
        pl.BlockSpec((tile_b, AP), lambda i: (i, 0)),
        pl.BlockSpec((8, 512), lambda i: (i, 0)),
    )

    # Only split batch tiles across TensorCores when there are enough tiles to
    # amortize the duplicated pinned-weight fetch (v7x megacore).
    dim_sem = ("parallel",) if num_tiles >= 4 else ("arbitrary",)

    q_raw, a2sum = pl.pallas_call(
        functools.partial(
            _dueling_kernel, batch_valid=B, tile_b=tile_b, mask_rows=mask_rows),
        grid=(num_tiles,),
        in_specs=in_specs,
        out_specs=out_specs,
        out_shape=(
            jax.ShapeDtypeStruct((Bp, AP), jnp.float32),
            jax.ShapeDtypeStruct((num_tiles * 8, 512), jnp.float32),
        ),
        compiler_params=pltpu.CompilerParams(dimension_semantics=dim_sem),
    )(*operands)

    # PyTorch's adv.mean() is GLOBAL over (batch, action):
    #   sum_{r,a} adv[r,a] = sum_k (sum_r a2[r,k]) * (sum_a aw3[k,a]) + B * sum_a ab3[a]
    a2_rowsum_total = jnp.sum(a2sum[0::8, :], axis=0)                  # (512,) f32
    adv_total = jnp.sum(a2_rowsum_total * prep["aw3_rowsum"][0]) + B * prep["ab3_sum"]
    adv_mean = adv_total * (1.0 / (B * action_size))
    return q_raw[:B, :action_size] - adv_mean


def init_params(key, state_size, action_size):
    """f32 master params mirroring nn.Linear's U(-1/sqrt(fan_in), +1/sqrt(fan_in)).
    Weights stored (in_features, out_features); biases stored (1, out)."""
    layer_dims = {
        "a1": (state_size, 1024), "a2": (1024, 512), "a3": (512, action_size),
        "v1": (state_size, 512),  "v2": (512, 512),  "v3": (512, action_size),
    }
    params = {}
    keys = jax.random.split(key, 2 * len(layer_dims))
    for i, (name, (fan_in, fan_out)) in enumerate(layer_dims.items()):
        bound = 1.0 / float(fan_in) ** 0.5
        wk, bk = keys[2 * i], keys[2 * i + 1]
        params[name[0] + "w" + name[1]] = jax.random.uniform(
            wk, (fan_in, fan_out), jnp.float32, -bound, bound)
        params[name[0] + "b" + name[1]] = jax.random.uniform(
            bk, (1, fan_out), jnp.float32, -bound, bound)
    return params


def prepare_params(params, action_size):
    """Kernel-side parameter prep:
      * fuse layer 1 across both streams:  w1 = [aw1 | vw1]  (S, 1536)
      * fuse both heads:                   w3 = [aw3 ; vw3]  (1024, AP), b3 = ab3+vb3
      * zero-pad the action dim to a 128-lane multiple
      * cast weights to bf16 (biases stay f32, added into the f32 accumulator)
      * precompute aw3 row-sums + ab3 sum for the global adv mean."""
    ap = _round_up(action_size, 128)
    pad = ap - action_size

    def pad_a(w, b):
        return jnp.pad(w, ((0, 0), (0, pad))), jnp.pad(b, ((0, 0), (0, pad)))

    aw3, ab3 = pad_a(params["aw3"], params["ab3"])
    vw3, vb3 = pad_a(params["vw3"], params["vb3"])
    bf = jnp.bfloat16

    # Row-sums of the bf16-rounded aw3 (f32 accumulate) so the wrapper-side adv
    # mean matches the bf16-matmul reference to f32-rounding accuracy.
    aw3_bf = params["aw3"].astype(bf).astype(jnp.float32)              # (512, A)
    aw3_rowsum = jnp.sum(aw3_bf, axis=1).reshape(1, 512)               # (1, 512) f32
    ab3_sum = jnp.sum(params["ab3"])                                   # scalar f32

    return {
        "w1": jnp.concatenate([params["aw1"], params["vw1"]], axis=1).astype(bf),
        "b1": jnp.concatenate([params["ab1"], params["vb1"]], axis=1),
        "aw2": params["aw2"].astype(bf), "ab2": params["ab2"],
        "vw2": params["vw2"].astype(bf), "vb2": params["vb2"],
        "w3": jnp.concatenate([aw3, vw3], axis=0).astype(bf),
        "b3": ab3 + vb3,
        "aw3_rowsum": aw3_rowsum,
        "ab3_sum": ab3_sum,
    }


def dueling_q_reference(x, params):
    """Pure-JAX f32 reference of the PyTorch forward."""
    adv = jax.nn.relu(x @ params["aw1"] + params["ab1"])
    adv = jax.nn.relu(adv @ params["aw2"] + params["ab2"])
    adv = adv @ params["aw3"] + params["ab3"]
    val = jax.nn.relu(x @ params["vw1"] + params["vb1"])
    val = jax.nn.relu(val @ params["vw2"] + params["vb2"])
    val = val @ params["vw3"] + params["vb3"]
    return val + (adv - jnp.mean(adv))


def dueling_q_reference_bf16(x, params):
    """Same math with the kernel's bf16-input / f32-accumulate casting."""
    bf = jnp.bfloat16

    def lin(a, w, b):
        return jnp.dot(a.astype(bf), w.astype(bf),
                       preferred_element_type=jnp.float32) + b

    adv = jax.nn.relu(lin(x, params["aw1"], params["ab1"]))
    adv = jax.nn.relu(lin(adv, params["aw2"], params["ab2"]))
    adv = lin(adv, params["aw3"], params["ab3"])
    val = jax.nn.relu(lin(x, params["vw1"], params["vb1"]))
    val = jax.nn.relu(lin(val, params["vw2"], params["vb2"]))
    val = lin(val, params["vw3"], params["vb3"])
    return val + (adv - jnp.mean(adv))


if __name__ == "__main__":
    state_size, action_size = 32, 4

    key = jax.random.PRNGKey(0)
    pkey, xkey1, xkey2, xkey3 = jax.random.split(key, 4)
    params = init_params(pkey, state_size, action_size)
    prep = prepare_params(params, action_size)

    # Small batch: single 8-row tile, grid=(1,), "arbitrary".
    x_small = jax.random.normal(xkey1, (8, state_size), jnp.float32)
    # Mid batch with padding: tile_b=256, one tile, last 56 rows masked.
    x_mid = jax.random.normal(xkey2, (200, state_size), jnp.float32)
    # Large batch: tile_b=512, 4 tiles, no padding, "parallel" semantics.
    x_big = jax.random.normal(xkey3, (2048, state_size), jnp.float32)

    for x in (x_small, x_mid, x_big):
        out = jax.block_until_ready(
            dueling_q_forward(x, prep, action_size=action_size))
        assert out.shape == (x.shape[0], action_size)
        ref_bf = dueling_q_reference_bf16(x, params)   # exact-cast reference (tight)
        ref_f32 = dueling_q_reference(x, params)       # f32 reference (bf16-loose)
        assert jnp.allclose(out, ref_bf, atol=2e-3, rtol=2e-3), "mismatch vs bf16 reference"
        assert jnp.allclose(out, ref_f32, atol=5e-2, rtol=5e-2), "mismatch vs f32 reference"

    print("KERNEL_OK")
</pallas_src>

<mosaic_0001>
module attributes {stable_mosaic.version = 11 : i64} {
  func.func @_dueling_kernel(%arg0: i32, %arg1: memref<8x32xf32, #tpu.memory_space<vmem>>, %arg2: memref<32x1536xbf16, #tpu.memory_space<vmem>>, %arg3: memref<1x1536xf32, #tpu.memory_space<vmem>>, %arg4: memref<1024x512xbf16, #tpu.memory_space<vmem>>, %arg5: memref<1x512xf32, #tpu.memory_space<vmem>>, %arg6: memref<512x512xbf16, #tpu.memory_space<vmem>>, %arg7: memref<1x512xf32, #tpu.memory_space<vmem>>, %arg8: memref<1024x128xbf16, #tpu.memory_space<vmem>>, %arg9: memref<1x128xf32, #tpu.memory_space<vmem>>, %arg10: memref<8x128xf32, #tpu.memory_space<vmem>>, %arg11: memref<8x512xf32, #tpu.memory_space<vmem>>) attributes {dimension_semantics = [#tpu.dimension_semantics<arbitrary>], iteration_bounds = array<i64: 1>, scalar_prefetch = 0 : i64, scratch_operands = 0 : i64, tpu.core_type = #tpu.core_type<tc>, window_params = [{transform_indices = @transform_0, window_bounds = array<i64: 8, 32>}, {pipeline_mode = #tpu.pipeline_mode<synchronous>, transform_indices = @transform_1, window_bounds = array<i64: 32, 1536>}, {pipeline_mode = #tpu.pipeline_mode<synchronous>, transform_indices = @transform_2, window_bounds = array<i64: 1, 1536>}, {pipeline_mode = #tpu.pipeline_mode<synchronous>, transform_indices = @transform_3, window_bounds = array<i64: 1024, 512>}, {pipeline_mode = #tpu.pipeline_mode<synchronous>, transform_indices = @transform_4, window_bounds = array<i64: 1, 512>}, {pipeline_mode = #tpu.pipeline_mode<synchronous>, transform_indices = @transform_5, window_bounds = array<i64: 512, 512>}, {pipeline_mode = #tpu.pipeline_mode<synchronous>, transform_indices = @transform_6, window_bounds = array<i64: 1, 512>}, {pipeline_mode = #tpu.pipeline_mode<synchronous>, transform_indices = @transform_7, window_bounds = array<i64: 1024, 128>}, {pipeline_mode = #tpu.pipeline_mode<synchronous>, transform_indices = @transform_8, window_bounds = array<i64: 1, 128>}, {transform_indices = @transform_9, window_bounds = array<i64: 8, 128>}, {transform_indices = @transform_10, window_bounds = array<i64: 8, 512>}]} {
    %c0 = arith.constant 0 : index
    %c0_0 = arith.constant 0 : index
    %0 = vector.load %arg1[%c0, %c0_0] : memref<8x32xf32, #tpu.memory_space<vmem>>, vector<8x32xf32>
    %1 = arith.truncf %0 : vector<8x32xf32> to vector<8x32xbf16>
    %c0_1 = arith.constant 0 : index
    %c0_2 = arith.constant 0 : index
    %2 = vector.load %arg2[%c0_1, %c0_2] : memref<32x1536xbf16, #tpu.memory_space<vmem>>, vector<32x1536xbf16>
    %cst = arith.constant dense<0.000000e+00> : vector<8x1536xf32>
    %3 = tpu.matmul %1, %2, %cst {dimension_numbers = #tpu.dot_dimension_numbers<[1], [0], [0], [1], [0, 0, 1, 1], [], []>} : vector<8x32xbf16>, vector<32x1536xbf16>, vector<8x1536xf32> -> vector<8x1536xf32>
    %c0_3 = arith.constant 0 : index
    %c0_4 = arith.constant 0 : index
    %4 = vector.load %arg3[%c0_3, %c0_4] : memref<1x1536xf32, #tpu.memory_space<vmem>>, vector<1x1536xf32>
    %5 = vector.broadcast %4 : vector<1x1536xf32> to vector<8x1536xf32>
    %6 = arith.addf %3, %5 : vector<8x1536xf32>
    %cst_5 = arith.constant 0.000000e+00 : f32
    %7 = vector.broadcast %cst_5 : f32 to vector<8x1536xf32>
    %8 = arith.maximumf %6, %7 : vector<8x1536xf32>
    %9 = arith.truncf %8 : vector<8x1536xf32> to vector<8x1536xbf16>
    %10 = vector.extract_strided_slice %9 {offsets = [0, 0], sizes = [8, 1024], strides = [1, 1]} : vector<8x1536xbf16> to vector<8x1024xbf16>
    %11 = vector.extract_strided_slice %9 {offsets = [0, 1024], sizes = [8, 512], strides = [1, 1]} : vector<8x1536xbf16> to vector<8x512xbf16>
    %c0_6 = arith.constant 0 : index
    %c0_7 = arith.constant 0 : index
    %12 = vector.load %arg4[%c0_6, %c0_7] : memref<1024x512xbf16, #tpu.memory_space<vmem>>, vector<1024x512xbf16>
    %cst_8 = arith.constant dense<0.000000e+00> : vector<8x512xf32>
    %13 = tpu.matmul %10, %12, %cst_8 {dimension_numbers = #tpu.dot_dimension_numbers<[1], [0], [0], [1], [0, 0, 1, 1], [], []>} : vector<8x1024xbf16>, vector<1024x512xbf16>, vector<8x512xf32> -> vector<8x512xf32>
    %c0_9 = arith.constant 0 : index
    %c0_10 = arith.constant 0 : index
    %14 = vector.load %arg5[%c0_9, %c0_10] : memref<1x512xf32, #tpu.memory_space<vmem>>, vector<1x512xf32>
    %15 = vector.broadcast %14 : vector<1x512xf32> to vector<8x512xf32>
    %16 = arith.addf %13, %15 : vector<8x512xf32>
    %cst_11 = arith.constant 0.000000e+00 : f32
    %17 = vector.broadcast %cst_11 : f32 to vector<8x512xf32>
    %18 = arith.maximumf %16, %17 : vector<8x512xf32>
    %19 = arith.truncf %18 : vector<8x512xf32> to vector<8x512xbf16>
    %c0_12 = arith.constant 0 : index
    %c0_13 = arith.constant 0 : index
    %20 = vector.load %arg6[%c0_12, %c0_13] : memref<512x512xbf16, #tpu.memory_space<vmem>>, vector<512x512xbf16>
    %cst_14 = arith.constant dense<0.000000e+00> : vector<8x512xf32>
    %21 = tpu.matmul %11, %20, %cst_14 {dimension_numbers = #tpu.dot_dimension_numbers<[1], [0], [0], [1], [0, 0, 1, 1], [], []>} : vector<8x512xbf16>, vector<512x512xbf16>, vector<8x512xf32> -> vector<8x512xf32>
    %c0_15 = arith.constant 0 : index
    %c0_16 = arith.constant 0 : index
    %22 = vector.load %arg7[%c0_15, %c0_16] : memref<1x512xf32, #tpu.memory_space<vmem>>, vector<1x512xf32>
    %23 = vector.broadcast %22 : vector<1x512xf32> to vector<8x512xf32>
    %24 = arith.addf %21, %23 : vector<8x512xf32>
    %cst_17 = arith.constant 0.000000e+00 : f32
    %25 = vector.broadcast %cst_17 : f32 to vector<8x512xf32>
    %26 = arith.maximumf %24, %25 : vector<8x512xf32>
    %27 = arith.truncf %26 : vector<8x512xf32> to vector<8x512xbf16>
    %28 = tpu.concatenate %19, %27 in 1 : vector<8x512xbf16>, vector<8x512xbf16> -> vector<8x1024xbf16>
    %c0_18 = arith.constant 0 : index
    %c0_19 = arith.constant 0 : index
    %29 = vector.load %arg8[%c0_18, %c0_19] : memref<1024x128xbf16, #tpu.memory_space<vmem>>, vector<1024x128xbf16>
    %cst_20 = arith.constant dense<0.000000e+00> : vector<8x128xf32>
    %30 = tpu.matmul %28, %29, %cst_20 {dimension_numbers = #tpu.dot_dimension_numbers<[1], [0], [0], [1], [0, 0, 1, 1], [], []>} : vector<8x1024xbf16>, vector<1024x128xbf16>, vector<8x128xf32> -> vector<8x128xf32>
    %c0_21 = arith.constant 0 : index
    %c0_22 = arith.constant 0 : index
    %31 = vector.load %arg9[%c0_21, %c0_22] : memref<1x128xf32, #tpu.memory_space<vmem>>, vector<1x128xf32>
    %32 = vector.broadcast %31 : vector<1x128xf32> to vector<8x128xf32>
    %33 = arith.addf %30, %32 : vector<8x128xf32>
    %c0_23 = arith.constant 0 : index
    %c0_24 = arith.constant 0 : index
    %34 = vector.load %arg10[%c0_23, %c0_24] : memref<8x128xf32, #tpu.memory_space<vmem>>, vector<8x128xf32>
    tpu.vector_store %arg10[%c0_23, %c0_24], %33 {strides = array<i32>} : memref<8x128xf32, #tpu.memory_space<vmem>>, vector<8x128xf32>,
    %35 = arith.extf %19 : vector<8x512xbf16> to vector<8x512xf32>
    %cst_25 = arith.constant dense<0.000000e+00> : vector<512xf32>
    %36 = vector.multi_reduction <add>, %35, %cst_25 [0] : vector<8x512xf32> to vector<512xf32>
    %37 = vector.shape_cast %36 : vector<512xf32> to vector<1x512xf32>
    %38 = vector.shape_cast %37 : vector<1x512xf32> to vector<1x512xf32>
    %39 = vector.broadcast %38 : vector<1x512xf32> to vector<8x512xf32>
    %c0_26 = arith.constant 0 : index
    %c0_27 = arith.constant 0 : index
    %40 = vector.load %arg11[%c0_26, %c0_27] : memref<8x512xf32, #tpu.memory_space<vmem>>, vector<8x512xf32>
    tpu.vector_store %arg11[%c0_26, %c0_27], %39 {strides = array<i32>} : memref<8x512xf32, #tpu.memory_space<vmem>>, vector<8x512xf32>,
    return
  }
  func.func @transform_0(%arg0: i32) -> (i32, i32) {
    %c0_i32 = arith.constant 0 : i32
    %c0_i32_0 = arith.constant 0 : i32
    return %arg0, %c0_i32 : i32, i32
  }
  func.func @transform_1(%arg0: i32) -> (i32, i32) {
    %c0_i32 = arith.constant 0 : i32
    %c0_i32_0 = arith.constant 0 : i32
    %c0_i32_1 = arith.constant 0 : i32
    return %c0_i32, %c0_i32_0 : i32, i32
  }
  func.func @transform_2(%arg0: i32) -> (i32, i32) {
    %c0_i32 = arith.constant 0 : i32
    %c0_i32_0 = arith.constant 0 : i32
    %c0_i32_1 = arith.constant 0 : i32
    return %c0_i32, %c0_i32_0 : i32, i32
  }
  func.func @transform_3(%arg0: i32) -> (i32, i32) {
    %c0_i32 = arith.constant 0 : i32
    %c0_i32_0 = arith.constant 0 : i32
    %c0_i32_1 = arith.constant 0 : i32
    return %c0_i32, %c0_i32_0 : i32, i32
  }
  func.func @transform_4(%arg0: i32) -> (i32, i32) {
    %c0_i32 = arith.constant 0 : i32
    %c0_i32_0 = arith.constant 0 : i32
    %c0_i32_1 = arith.constant 0 : i32
    return %c0_i32, %c0_i32_0 : i32, i32
  }
  func.func @transform_5(%arg0: i32) -> (i32, i32) {
    %c0_i32 = arith.constant 0 : i32
    %c0_i32_0 = arith.constant 0 : i32
    %c0_i32_1 = arith.constant 0 : i32
    return %c0_i32, %c0_i32_0 : i32, i32
  }
  func.func @transform_6(%arg0: i32) -> (i32, i32) {
    %c0_i32 = arith.constant 0 : i32
    %c0_i32_0 = arith.constant 0 : i32
    %c0_i32_1 = arith.constant 0 : i32
    return %c0_i32, %c0_i32_0 : i32, i32
  }
  func.func @transform_7(%arg0: i32) -> (i32, i32) {
    %c0_i32 = arith.constant 0 : i32
    %c0_i32_0 = arith.constant 0 : i32
    %c0_i32_1 = arith.constant 0 : i32
    return %c0_i32, %c0_i32_0 : i32, i32
  }
  func.func @transform_8(%arg0: i32) -> (i32, i32) {
    %c0_i32 = arith.constant 0 : i32
    %c0_i32_0 = arith.constant 0 : i32
    %c0_i32_1 = arith.constant 0 : i32
    return %c0_i32, %c0_i32_0 : i32, i32
  }
  func.func @transform_9(%arg0: i32) -> (i32, i32) {
    %c0_i32 = arith.constant 0 : i32
    %c0_i32_0 = arith.constant 0 : i32
    return %arg0, %c0_i32 : i32, i32
  }
  func.func @transform_10(%arg0: i32) -> (i32, i32) {
    %c0_i32 = arith.constant 0 : i32
    %c0_i32_0 = arith.constant 0 : i32
    return %arg0, %c0_i32 : i32, i32
  }
}

</mosaic_0001>

<bundles_post_ra>
// kernel: dueling_q_forward.1
= control target key start
LH: loop header
LB: loop body
LE: loop exit
PB: predicated region body
PF: predicated region fallthrough
CT: control target
= control target key end

     0   :  { %16 = vsyncpa [#allocation3], 0  ;;  %s5867_s0 = inlined_call_operand.hbm [shape: f32[8,32], index: 0, kind: input, shape index: {}]   ;;  %s5868_s1 = inlined_call_operand.hbm [shape: bf16[32,1536], index: 1, kind: input, shape index: {}]   ;;  %s5869_s2 = inlined_call_operand.vmem [shape: f32[1,1536], index: 2, kind: input, shape index: {}]   ;;  %s5870_s3 = inlined_call_operand.hbm [shape: bf16[1024,512], index: 3, kind: input, shape index: {}]   ;;  %s5871_s4 = inlined_call_operand.hbm [shape: f32[1,512], index: 4, kind: input, shape index: {}]   ;;  %s5872_s5 = inlined_call_operand.hbm [shape: bf16[512,512], index: 5, kind: input, shape index: {}]   ;;  %s5873_s6 = inlined_call_operand.hbm [shape: f32[1,512], index: 6, kind: input, shape index: {}]   ;;  %s5874_s7 = inlined_call_operand.hbm [shape: bf16[1024,128], index: 7, kind: input, shape index: {}]   ;;  %s5875_s8 = inlined_call_operand.vmem [shape: f32[1,128], index: 8, kind: input, shape index: {}]   ;;  %s5876_s9 = inlined_call_operand.vmem [shape: f32[8,128], index: 9, kind: output, shape index: {0}]   ;;  %s5877_s10 = inlined_call_operand.vmem [shape: f32[8,512], index: 10, kind: output, shape index: {1}]  }
   0x1   :  { %17 = vsyncpa [#allocation5], 0 }
   0x2   :  { %18 = vsyncpa [#allocation8], 0 }
   0x3   :  { %19 = vsyncpa [#allocation11], 0  ;;  %s5593_s13 = smov [#allocation4]  }
   0x4   :  { %s35_s14 = sshll.u32 %s5593_s13, 4  ;;  %s36_s14 = int_to_ptr.vmem [resolvable:$true] %s35_s14 }
   0x5   :  { %s5453_s15 = scalar_lea.vmem %s36_s14, 3072  ;;  %p5458_p1 = scmp.lt.s32.totalorder %s36_s14, %s36_s14 }
   0x6   :  { %p5454_p0 = scmp.ne.s32.totalorder %s36_s14, %s5453_s15  ;;  %p5459_p2 = scmp.lt.s32.totalorder %s5453_s15, %s5453_s15 }
   0x8   :  { %p5460_p3 = por %p5459_p2, %p5458_p1 }
   0xa   :  { %p5461_p4 = pnand %p5460_p3, %p5454_p0 }
   0xc   :  { %5464 = shalt.err (!%p5461_p4)
}
   0xd   :  { %s5594_s16 = smov 768   ;;  %s5595_s17 = smov 48  }
   0xe   :  { %41 = dma.hbm_to_vmem [thread:$0]  %s5868_s1, 3072, %s36_s14, [#allocation5], %s5594_s16, %s5594_s16, %s5595_s17  }
   0xf   :  { %s5596_s20 = smov [#allocation7]   ;;  %s5597_s22 = smov [#allocation10]  }
  0x10   :  { %s62_s21 = sshll.u32 %s5596_s20, 4  ;;  %s84_s23 = sshll.u32 %s5597_s22, 4  ;;  %s63_s21 = int_to_ptr.vmem [resolvable:$true] %s62_s21  ;;  %s85_s23 = int_to_ptr.vmem [resolvable:$true] %s84_s23 }
  0x11   :  { %s5473_s24 = scalar_lea.vmem %s63_s21, 64  ;;  %p5478_p6 = scmp.lt.s32.totalorder %s63_s21, %s63_s21 }
  0x12   :  { %p5474_p5 = scmp.ne.s32.totalorder %s63_s21, %s5473_s24  ;;  %p5479_p7 = scmp.lt.s32.totalorder %s5473_s24, %s5473_s24 }
  0x14   :  { %p5480_p8 = por %p5479_p7, %p5478_p6 }
  0x16   :  { %p5481_p9 = pnand %p5480_p8, %p5474_p5 }
  0x18   :  { %5484 = shalt.err (!%p5481_p9)
}
  0x19   :  { %65 = dma.hbm_to_vmem [thread:$0]  %s5871_s4, 64, %s63_s21, [#allocation8]  }
  0x1a   :  { %s5493_s27 = scalar_lea.vmem %s85_s23, 64  ;;  %p5498_p11 = scmp.lt.s32.totalorder %s85_s23, %s85_s23 }
  0x1b   :  { %p5494_p10 = scmp.ne.s32.totalorder %s85_s23, %s5493_s27  ;;  %p5499_p12 = scmp.lt.s32.totalorder %s5493_s27, %s5493_s27 }
  0x1d   :  { %p5500_p13 = por %p5499_p12, %p5498_p11 }
  0x1f   :  { %p5501_p0 = pnand %p5500_p13, %p5494_p10 }
  0x21   :  { %5504 = shalt.err (!%p5501_p0)
}
  0x22   :  { %87 = dma.hbm_to_vmem [thread:$0]  %s5873_s6, 64, %s85_s23, [#allocation11]  }
  0x23   :  { %s5598_s29 = smov [#allocation2]   ;;  %s5599_s11 = smov [#allocation6]  }
  0x24   :  { %s26_s30 = sshll.u32 %s5598_s29, 4  ;;  %s49_s12 = sshll.u32 %s5599_s11, 4  ;;  %s27_s30 = int_to_ptr.vmem [resolvable:$true] %s26_s30  ;;  %s50_s12 = int_to_ptr.vmem [resolvable:$true] %s49_s12 }
  0x25   :  { %s5513_s13 = scalar_lea.vmem %s27_s30, 128  ;;  %p5518_p2 = scmp.lt.s32.totalorder %s27_s30, %s27_s30 }
  0x26   :  { %p5514_p1 = scmp.ne.s32.totalorder %s27_s30, %s5513_s13  ;;  %p5519_p3 = scmp.lt.s32.totalorder %s5513_s13, %s5513_s13 }
  0x28   :  { %p5520_p4 = por %p5519_p3, %p5518_p2 }
  0x2a   :  { %p5521_p5 = pnand %p5520_p4, %p5514_p1 }
  0x2c   :  { %5524 = shalt.err (!%p5521_p5)
}
  0x2d   :  { %29 = dma.hbm_to_vmem [thread:$0]  %s5867_s0, 128, %s27_s30, [#allocation3]  }
  0x2e   :  { %s5533_s15 = scalar_lea.vmem %s50_s12, 32768  ;;  %p5538_p7 = scmp.lt.s32.totalorder %s50_s12, %s50_s12 }
  0x2f   :  { %p5534_p6 = scmp.ne.s32.totalorder %s50_s12, %s5533_s15  ;;  %p5539_p8 = scmp.lt.s32.totalorder %s5533_s15, %s5533_s15 }
  0x31   :  { %p5540_p9 = por %p5539_p8, %p5538_p7 }
  0x33   :  { %p5541_p10 = pnand %p5540_p9, %p5534_p6 }
  0x35   :  { %5544 = shalt.err (!%p5541_p10)
}
  0x36   :  { %s5600_s6 = smov 256   ;;  %s5601_s16 = smov 16  }
  0x37   :  { %55 = dma.hbm_to_vmem [thread:$0]  %s5870_s3, 32768, %s50_s12, [#allocation5], %s5600_s6, %s5600_s6, %s5601_s16  }
  0x38   :  { %s5602_s19 = smov [#allocation9]   ;;  %s5603_s21 = smov [#allocation12]  }
  0x39   :  { %s71_s20 = sshll.u32 %s5602_s19, 4  ;;  %s93_s22 = sshll.u32 %s5603_s21, 4  ;;  %s72_s20 = int_to_ptr.vmem [resolvable:$true] %s71_s20  ;;  %s94_s22 = int_to_ptr.vmem [resolvable:$true] %s93_s22 }
  0x3a   :  { %s5553_s0 = scalar_lea.vmem %s72_s20, 16384  ;;  %p5558_p12 = scmp.lt.s32.totalorder %s72_s20, %s72_s20 }
  0x3b   :  { %p5554_p11 = scmp.ne.s32.totalorder %s72_s20, %s5553_s0  ;;  %p5559_p13 = scmp.lt.s32.totalorder %s5553_s0, %s5553_s0 }
  0x3d   :  { %p5560_p0 = por %p5559_p13, %p5558_p12 }
  0x3f   :  { %p5561_p1 = pnand %p5560_p0, %p5554_p11 }
  0x41   :  { %5564 = shalt.err (!%p5561_p1)
}
  0x42   :  { %77 = dma.hbm_to_vmem [thread:$0]  %s5872_s5, 16384, %s72_s20, [#allocation8], %s5600_s6, %s5600_s6, %s5601_s16  }
  0x43   :  { %s5573_s25 = scalar_lea.vmem %s94_s22, 8192  ;;  %p5578_p3 = scmp.lt.s32.totalorder %s94_s22, %s94_s22 }
  0x44   :  { %p5574_p2 = scmp.ne.s32.totalorder %s94_s22, %s5573_s25  ;;  %p5579_p4 = scmp.lt.s32.totalorder %s5573_s25, %s5573_s25 }
  0x46   :  { %p5580_p5 = por %p5579_p4, %p5578_p3 }
  0x48   :  { %p5581_p6 = pnand %p5580_p5, %p5574_p2 }
  0x4a   :  { %5584 = shalt.err (!%p5581_p6)
}
  0x4b   :  { %s5604_s3 = smov 64   ;;  %s5605_s26 = smov 4  }
  0x4c   :  { %99 = dma.hbm_to_vmem [thread:$0]  %s5874_s7, 8192, %s94_s22, [#allocation11], %s5604_s3, %s5604_s3, %s5605_s26  }
  0x4d   :  { %5585 = dma.done.wait [#allocation3], 128  }
  0x4e   :  { %5586 = vsyncadd [#allocation3], 4294967168 }
  0x4f   :  { %5587 = dma.done.wait [#allocation5], 35840  }
  0x50   :  { %5588 = vsyncadd [#allocation5], 4294931456 }
  0x51   :  { %5589 = dma.done.wait [#allocation8], 16448  }
  0x52   :  { %5590 = vsyncadd [#allocation8], 4294950848 }
  0x53   :  { %5591 = dma.done.wait [#allocation11], 8256  }
  0x54   :  { %5592 = vsyncadd [#allocation11], 4294959040  ;;  %v5606_v0 = vmov 0   ;;  %v4769_v1 = vld [vmem:[#allocation4 + $0x64] ss:$48 sps:$4 sm:$0xff]   ;;  %v124_v9 = vld [vmem:[#allocation2] sm:$0xff] }
  0x55   :  { %370 = vmatprep.mubr.bf16.mxu0 %v5606_v0  ;;  %411 = vmatprep.mubr.bf16.mxu1 %v5606_v0  ;;  %v4771_v2 = vld [vmem:[#allocation4 + $0x6c] ss:$48 sps:$4 sm:$0xff]   ;;  %v4773_v3 = vld [vmem:[#allocation4 + $0x60] ss:$48 sps:$4 sm:$0xff]   ;;  %v4774_v4 = vld [vmem:[#allocation4 + $0x68] ss:$48 sps:$4 sm:$0xff]   ;;  %v125_v12 = vpack.c.bf16 %v124_v9, %v124_v9 }
  0x56   :  { %350 = vmatprep.subr.bf16.mxu0 %v4769_v1  ;;  %391 = vmatprep.subr.bf16.mxu1 %v4771_v2  ;;  %v4775_v5 = vld [vmem:[#allocation4 + $0x4] ss:$48 sps:$4 sm:$0xff]   ;;  %v4777_v6 = vld [vmem:[#allocation4 + $0xc] ss:$48 sps:$4 sm:$0xff]   ;;  %v4779_v7 = vld [vmem:[#allocation4] ss:$48 sps:$4 sm:$0xff]  }
  0x57   :  { %351 = vmatpush1.bf16.msra.mxu0 %v4773_v3  ;;  %392 = vmatpush1.bf16.msra.mxu1 %v4774_v4  ;;  %v4780_v8 = vld [vmem:[#allocation4 + $0x8] ss:$48 sps:$4 sm:$0xff]   ;;  %v4781_v10 = vld [vmem:[#allocation4 + $0x70] ss:$48 sps:$4 sm:$0xff]   ;;  %v4783_v11 = vld [vmem:[#allocation4 + $0x74] ss:$48 sps:$4 sm:$0xff]  }
  0x58   :  { %352 = vmatprep.subr.bf16.mxu0 %v4775_v5  ;;  %393 = vmatprep.subr.bf16.mxu1 %v4777_v6  ;;  %v4784_v13 = vld [vmem:[#allocation4 + $0x78] ss:$48 sps:$4 sm:$0xff]   ;;  %vm334_vm0 = vcmask 261120   ;;  %v4786_v14 = vld [vmem:[#allocation4 + $0x7c] ss:$48 sps:$4 sm:$0xff]  }
  0x59   :  { %v4789_v15 = vld [vmem:[#allocation4 + $0x14] ss:$48 sps:$4 sm:$0xff]   ;;  %v4792_v16 = vld [vmem:[#allocation4 + $0x1c] ss:$48 sps:$4 sm:$0xff]   ;;  %v4787_v17 = vld [vmem:[#allocation4 + $0x10] ss:$48 sps:$4 sm:$0xff]  }
  0x5a   :  { %v4790_v18 = vld [vmem:[#allocation4 + $0x18] ss:$48 sps:$4 sm:$0xff]   ;;  %v4795_v19 = vld [vmem:[#allocation4 + $0x84] ss:$48 sps:$4 sm:$0xff]   ;;  %v4798_v20 = vld [vmem:[#allocation4 + $0x8c] ss:$48 sps:$4 sm:$0xff]  }
  0x5b   :  { %353 = vmatpush1.bf16.msra.mxu0 %v4779_v7  ;;  %394 = vmatpush1.bf16.msra.mxu1 %v4780_v8  ;;  %v4793_v21 = vld [vmem:[#allocation4 + $0x80] ss:$48 sps:$4 sm:$0xff]   ;;  %v4796_v22 = vld [vmem:[#allocation4 + $0x88] ss:$48 sps:$4 sm:$0xff]   ;;  %v4801_v23 = vld [vmem:[#allocation4 + $0x24] ss:$48 sps:$4 sm:$0xff]  }
  0x5c   :  { %432 = vmatprep.subr.bf16.mxu0 %v4783_v11  ;;  %473 = vmatprep.subr.bf16.mxu1 %v4786_v14  ;;  %v4804_v24 = vld [vmem:[#allocation4 + $0x2c] ss:$48 sps:$4 sm:$0xff]   ;;  %v4799_v25 = vld [vmem:[#allocation4 + $0x20] ss:$48 sps:$4 sm:$0xff]   ;;  %v4802_v26 = vld [vmem:[#allocation4 + $0x28] ss:$48 sps:$4 sm:$0xff]  }
  0x5d   :  { %v4807_v27 = vld [vmem:[#allocation6 + $0xe4] ss:$16 sps:$4 sm:$0xff]   ;;  %v4805_v29 = vld [vmem:[#allocation6 + $0xe0] ss:$16 sps:$4 sm:$0xff]  }
  0x5e   :  { %4212 = vmatmul.mubr.msk.bf16.vlgmr.msra.gmra.mxu0 %vm334_vm0, %v125_v12  ;;  %4213 = vmatmul.mubr.msk.bf16.vlgmr.msra.gmra.mxu1 %vm334_vm0, %v125_v12  ;;  %v4810_v28 = vld [vmem:[#allocation6 + $0x2e4] ss:$16 sps:$4 sm:$0xff]   ;;  %v4808_v30 = vld [vmem:[#allocation6 + $0x2e0] ss:$16 sps:$4 sm:$0xff]  }
  0x5f   :  { %433 = vmatpush1.bf16.msra.mxu0 %v4781_v10  ;;  %474 = vmatpush1.bf16.msra.mxu1 %v4784_v13  ;;  %v4813_v31 = vld [vmem:[#allocation6 + $0xc4] ss:$16 sps:$4 sm:$0xff]   ;;  %v4811_v33 = vld [vmem:[#allocation6 + $0xc0] ss:$16 sps:$4 sm:$0xff]  }
  0x60   :  { %434 = vmatprep.subr.bf16.mxu0 %v4789_v15  ;;  %475 = vmatprep.subr.bf16.mxu1 %v4792_v16  ;;  %v4816_v32 = vld [vmem:[#allocation6 + $0x2c4] ss:$16 sps:$4 sm:$0xff]   ;;  %v4814_v34 = vld [vmem:[#allocation6 + $0x2c0] ss:$16 sps:$4 sm:$0xff]  }
  0x61   :  { %452 = vmatprep.mubr.bf16.mxu0 %v5606_v0  ;;  %493 = vmatprep.mubr.bf16.mxu1 %v5606_v0  ;;  %v4819_v35 = vld [vmem:[#allocation6 + $0xa4] ss:$16 sps:$4 sm:$0xff]   ;;  %v4817_v37 = vld [vmem:[#allocation6 + $0xa0] ss:$16 sps:$4 sm:$0xff]  }
  0x62   :  { %v4822_v36 = vld [vmem:[#allocation6 + $0x2a4] ss:$16 sps:$4 sm:$0xff]   ;;  %v4820_v38 = vld [vmem:[#allocation6 + $0x2a0] ss:$16 sps:$4 sm:$0xff]  }
  0x63   :  { %435 = vmatpush1.bf16.msra.mxu0 %v4787_v17  ;;  %476 = vmatpush1.bf16.msra.mxu1 %v4790_v18  ;;  %v4825_v39 = vld [vmem:[#allocation6 + $0x84] ss:$16 sps:$4 sm:$0xff]   ;;  %v4823_v41 = vld [vmem:[#allocation6 + $0x80] ss:$16 sps:$4 sm:$0xff]  }
  0x64   :  { %514 = vmatprep.subr.bf16.mxu0 %v4795_v19  ;;  %555 = vmatprep.subr.bf16.mxu1 %v4798_v20  ;;  %v4828_v40 = vld [vmem:[#allocation6 + $0x284] ss:$16 sps:$4 sm:$0xff]   ;;  %v4826_v42 = vld [vmem:[#allocation6 + $0x280] ss:$16 sps:$4 sm:$0xff]  }
  0x65   :  { %v4831_v43 = vld [vmem:[#allocation6 + $0x64] ss:$16 sps:$4 sm:$0xff]   ;;  %v4829_v45 = vld [vmem:[#allocation6 + $0x60] ss:$16 sps:$4 sm:$0xff]  }
  0x66   :  { %4214 = vmatmul.mubr.msk.bf16.vlgmr.msra.gmra.mxu0 %vm334_vm0, %v125_v12  ;;  %4215 = vmatmul.mubr.msk.bf16.vlgmr.msra.gmra.mxu1 %vm334_vm0, %v125_v12  ;;  %v4834_v44 = vld [vmem:[#allocation6 + $0x264] ss:$16 sps:$4 sm:$0xff]   ;;  %v4832_v46 = vld [vmem:[#allocation6 + $0x260] ss:$16 sps:$4 sm:$0xff]  }
  0x67   :  { %515 = vmatpush1.bf16.msra.mxu0 %v4793_v21  ;;  %556 = vmatpush1.bf16.msra.mxu1 %v4796_v22  ;;  %v4837_v47 = vld [vmem:[#allocation6 + $0x44] ss:$16 sps:$4 sm:$0xff]   ;;  %v4835_v49 = vld [vmem:[#allocation6 + $0x40] ss:$16 sps:$4 sm:$0xff]  }
  0x68   :  { %516 = vmatprep.subr.bf16.mxu0 %v4801_v23  ;;  %557 = vmatprep.subr.bf16.mxu1 %v4804_v24  ;;  %v4840_v48 = vld [vmem:[#allocation6 + $0x244] ss:$16 sps:$4 sm:$0xff]   ;;  %v4838_v50 = vld [vmem:[#allocation6 + $0x240] ss:$16 sps:$4 sm:$0xff]  }
  0x69   :  { %534 = vmatprep.mubr.bf16.mxu0 %v5606_v0  ;;  %575 = vmatprep.mubr.bf16.mxu1 %v5606_v0  ;;  %v4843_v51 = vld [vmem:[#allocation6 + $0x24] ss:$16 sps:$4 sm:$0xff]   ;;  %v4841_v53 = vld [vmem:[#allocation6 + $0x20] ss:$16 sps:$4 sm:$0xff]  }
  0x6a   :  { %v4846_v52 = vld [vmem:[#allocation6 + $0x224] ss:$16 sps:$4 sm:$0xff]   ;;  %v4844_v54 = vld [vmem:[#allocation6 + $0x220] ss:$16 sps:$4 sm:$0xff]  }
  0x6b   :  { %517 = vmatpush1.bf16.msra.mxu0 %v4799_v25  ;;  %558 = vmatpush1.bf16.msra.mxu1 %v4802_v26  ;;  %v4849_v55 = vld [vmem:[#allocation6 + $0x4] ss:$16 sps:$4 sm:$0xff]   ;;  %v4847_v57 = vld [vmem:[#allocation6] ss:$16 sps:$4 sm:$0xff]  }
  0x6c   :  { %2166 = vmatprep.subr.bf16.mxu0 %v4807_v27  ;;  %2207 = vmatprep.subr.bf16.mxu1 %v4810_v28  ;;  %v4852_v56 = vld [vmem:[#allocation6 + $0x204] ss:$16 sps:$4 sm:$0xff]   ;;  %v4850_v58 = vld [vmem:[#allocation6 + $0x200] ss:$16 sps:$4 sm:$0xff]  }
  0x6d   :  { %v4855_v59 = vld [vmem:[#allocation6 + $0x1e4] ss:$16 sps:$4 sm:$0xff]   ;;  %v4853_v61 = vld [vmem:[#allocation6 + $0x1e0] ss:$16 sps:$4 sm:$0xff]  }
  0x6e   :  { %4216 = vmatmul.mubr.msk.bf16.vlgmr.msra.gmra.mxu0 %vm334_vm0, %v125_v12  ;;  %4217 = vmatmul.mubr.msk.bf16.vlgmr.msra.gmra.mxu1 %vm334_vm0, %v125_v12  ;;  %v4858_v60 = vld [vmem:[#allocation6 + $0x3e4] ss:$16 sps:$4 sm:$0xff]   ;;  %v4856_v62 = vld [vmem:[#allocation6 + $0x3e0] ss:$16 sps:$4 sm:$0xff]  }
  0x6f   :  { %2167 = vmatpush1.bf16.msra.mxu0 %v4805_v29  ;;  %2208 = vmatpush1.bf16.msra.mxu1 %v4808_v30  ;;  %v4861_v63 = vld [vmem:[#allocation6 + $0x1c4] ss:$16 sps:$4 sm:$0xff]   ;;  %v4859_v1 = vld [vmem:[#allocation6 + $0x1c0] ss:$16 sps:$4 sm:$0xff]   ;;  %v154_v29 = vlaneseq }
  0x70   :  { %2168 = vmatprep.subr.bf16.mxu0 %v4813_v31  ;;  %2209 = vmatprep.subr.bf16.mxu1 %v4816_v32  ;;  %v4864_v0 = vld [vmem:[#allocation6 + $0x3c4] ss:$16 sps:$4 sm:$0xff]   ;;  %v4862_v2 = vld [vmem:[#allocation6 + $0x3c0] ss:$16 sps:$4 sm:$0xff]   ;;  %v5694_v31 = vld [vmem:[%s5869_s2] sm:$0xff] }
  0x71   :  { %v4867_v3 = vld [vmem:[#allocation6 + $0x1a4] ss:$16 sps:$4 sm:$0xff]   ;;  %v4865_v5 = vld [vmem:[#allocation6 + $0x1a0] ss:$16 sps:$4 sm:$0xff]   ;;  %v5689_v30 = vshrl.u32 %v154_v29, 7 }
  0x72   :  { %v4870_v4 = vld [vmem:[#allocation6 + $0x3a4] ss:$16 sps:$4 sm:$0xff]   ;;  %v4868_v6 = vld [vmem:[#allocation6 + $0x3a0] ss:$16 sps:$4 sm:$0xff]  }
  0x73   :  { %2169 = vmatpush1.bf16.msra.mxu0 %v4811_v33  ;;  %2210 = vmatpush1.bf16.msra.mxu1 %v4814_v34  ;;  %v4873_v7 = vld [vmem:[#allocation6 + $0x184] ss:$16 sps:$4 sm:$0xff]   ;;  %v4871_v9 = vld [vmem:[#allocation6 + $0x180] ss:$16 sps:$4 sm:$0xff]   ;;  %v5697_v32 = vsub.s32 0, %v5689_v30  ;;  %v5700_v33 = vsub.s32 2, %v5689_v30 }
  0x74   :  { %2170 = vmatprep.subr.bf16.mxu0 %v4819_v35  ;;  %2211 = vmatprep.subr.bf16.mxu1 %v4822_v36  ;;  %v4876_v8 = vld [vmem:[#allocation6 + $0x384] ss:$16 sps:$4 sm:$0xff]   ;;  %v4874_v10 = vld [vmem:[#allocation6 + $0x380] ss:$16 sps:$4 sm:$0xff]   ;;  %v5703_v34 = vsub.s32 1, %v5689_v30  ;;  %v5706_v35 = vsub.s32 3, %v5689_v30 }
  0x75   :  { %v4879_v11 = vld [vmem:[#allocation6 + $0x164] ss:$16 sps:$4 sm:$0xff]   ;;  %v4877_v13 = vld [vmem:[#allocation6 + $0x160] ss:$16 sps:$4 sm:$0xff]   ;;  %v157_v36 = vrot.slane %v5694_v31, %v5697_v32 }
  0x76   :  { %v4882_v12 = vld [vmem:[#allocation6 + $0x364] ss:$16 sps:$4 sm:$0xff]   ;;  %v4880_v14 = vld [vmem:[#allocation6 + $0x360] ss:$16 sps:$4 sm:$0xff]  }
  0x77   :  { %2171 = vmatpush1.bf16.msra.mxu0 %v4817_v37  ;;  %2212 = vmatpush1.bf16.msra.mxu1 %v4820_v38  ;;  %v4885_v15 = vld [vmem:[#allocation6 + $0x144] ss:$16 sps:$4 sm:$0xff]   ;;  %v4883_v17 = vld [vmem:[#allocation6 + $0x140] ss:$16 sps:$4 sm:$0xff]   ;;  %v165_v37 = vrot.slane %v5694_v31, %v5700_v33  ;;  %v161_v38 = vrot.slane %v5694_v31, %v5703_v34 }
  0x78   :  { %2172 = vmatprep.subr.bf16.mxu0 %v4825_v39  ;;  %2213 = vmatprep.subr.bf16.mxu1 %v4828_v40  ;;  %v4888_v16 = vld [vmem:[#allocation6 + $0x344] ss:$16 sps:$4 sm:$0xff]   ;;  %v4886_v18 = vld [vmem:[#allocation6 + $0x340] ss:$16 sps:$4 sm:$0xff]   ;;  %v169_v39 = vrot.slane %v5694_v31, %v5706_v35 }
  0x79   :  { %v4891_v19 = vld [vmem:[#allocation6 + $0x124] ss:$16 sps:$4 sm:$0xff]   ;;  %v4889_v21 = vld [vmem:[#allocation6 + $0x120] ss:$16 sps:$4 sm:$0xff]  }
  0x7a   :  { %v4894_v20 = vld [vmem:[#allocation6 + $0x324] ss:$16 sps:$4 sm:$0xff]   ;;  %v4892_v22 = vld [vmem:[#allocation6 + $0x320] ss:$16 sps:$4 sm:$0xff]  }
  0x7b   :  { %2173 = vmatpush1.bf16.msra.mxu0 %v4823_v41  ;;  %2214 = vmatpush1.bf16.msra.mxu1 %v4826_v42  ;;  %v4897_v23 = vld [vmem:[#allocation6 + $0x104] ss:$16 sps:$4 sm:$0xff]   ;;  %v4895_v25 = vld [vmem:[#allocation6 + $0x100] ss:$16 sps:$4 sm:$0xff]  }
  0x7c   :  { %2174 = vmatprep.subr.bf16.mxu0 %v4831_v43  ;;  %2215 = vmatprep.subr.bf16.mxu1 %v4834_v44  ;;  %v4900_v24 = vld [vmem:[#allocation6 + $0x304] ss:$16 sps:$4 sm:$0xff]   ;;  %v4898_v26 = vld [vmem:[#allocation6 + $0x300] ss:$16 sps:$4 sm:$0xff]  }
  0x7d   :  { %v4903_v27 = vld [vmem:[#allocation6 + $0x4e4] ss:$16 sps:$4 sm:$0xff]  }
  0x7e   :  { %v4906_v28 = vld [vmem:[#allocation6 + $0x6e4] ss:$16 sps:$4 sm:$0xff]  }
  0x7f   :  { %2175 = vmatpush1.bf16.msra.mxu0 %v4829_v45  ;;  %2216 = vmatpush1.bf16.msra.mxu1 %v4832_v46  ;;  %v176_v46 = vsub.s32 5, %v5689_v30 }
  0x80   :  { %2176 = vmatprep.subr.bf16.mxu0 %v4837_v47  ;;  %2217 = vmatprep.subr.bf16.mxu1 %v4840_v48 }
  0x83   :  { %2177 = vmatpush1.bf16.msra.mxu0 %v4835_v49  ;;  %2218 = vmatpush1.bf16.msra.mxu1 %v4838_v50  ;;  %v184_v50 = vsub.s32 7, %v5689_v30 }
  0x84   :  { %2178 = vmatprep.subr.bf16.mxu0 %v4843_v51  ;;  %2219 = vmatprep.subr.bf16.mxu1 %v4846_v52 }
  0x87   :  { %2179 = vmatpush1.bf16.msra.mxu0 %v4841_v53  ;;  %2220 = vmatpush1.bf16.msra.mxu1 %v4844_v54 }
  0x88   :  { %2180 = vmatprep.subr.bf16.mxu0 %v4849_v55  ;;  %2221 = vmatprep.subr.bf16.mxu1 %v4852_v56  ;;  %v4901_v56 = vld [vmem:[#allocation6 + $0x4e0] ss:$16 sps:$4 sm:$0xff]  }
  0x8b   :  { %2181 = vmatpush1.bf16.msra.mxu0 %v4847_v57  ;;  %2222 = vmatpush1.bf16.msra.mxu1 %v4850_v58  ;;  %v4904_v57 = vld [vmem:[#allocation6 + $0x6e0] ss:$16 sps:$4 sm:$0xff]  }
  0x8c   :  { %2182 = vmatprep.subr.bf16.mxu0 %v4855_v59  ;;  %2223 = vmatprep.subr.bf16.mxu1 %v4858_v60 }
  0x8f   :  { %2183 = vmatpush2.bf16.msra.mxu0 %v4853_v61  ;;  %2224 = vmatpush2.bf16.msra.mxu1 %v4856_v62  ;;  %v4909_v61 = vld [vmem:[#allocation6 + $0x4c4] ss:$16 sps:$4 sm:$0xff]  }
  0x90   :  { %2184 = vmatprep.subr.bf16.mxu0 %v4861_v63  ;;  %2225 = vmatprep.subr.bf16.mxu1 %v4864_v0  ;;  %v4912_v62 = vld [vmem:[#allocation6 + $0x6c4] ss:$16 sps:$4 sm:$0xff]  }
  0x93   :  { %2185 = vmatpush2.bf16.msra.mxu0 %v4859_v1  ;;  %2226 = vmatpush2.bf16.msra.mxu1 %v4862_v2  ;;  %v177_v1 = vrot.slane %v5694_v31, %v176_v46  ;;  %v185_v2 = vrot.slane %v5694_v31, %v184_v50  ;;  %v4933_v46 = vld [vmem:[#allocation6 + $0x444] ss:$16 sps:$4 sm:$0xff]  }
  0x94   :  { %2186 = vmatprep.subr.bf16.mxu0 %v4867_v3  ;;  %2227 = vmatprep.subr.bf16.mxu1 %v4870_v4  ;;  %v4939_v50 = vld [vmem:[#allocation6 + $0x424] ss:$16 sps:$4 sm:$0xff]  }
  0x97   :  { %2187 = vmatpush2.bf16.msra.mxu0 %v4865_v5  ;;  %2228 = vmatpush2.bf16.msra.mxu1 %v4868_v6  ;;  %v4907_v6 = vld [vmem:[#allocation6 + $0x4c0] ss:$16 sps:$4 sm:$0xff]  }
  0x98   :  { %2188 = vmatprep.subr.bf16.mxu0 %v4873_v7  ;;  %2229 = vmatprep.subr.bf16.mxu1 %v4876_v8  ;;  %v4910_v7 = vld [vmem:[#allocation6 + $0x6c0] ss:$16 sps:$4 sm:$0xff]   ;;  %v4915_v8 = vld [vmem:[#allocation6 + $0x4a4] ss:$16 sps:$4 sm:$0xff]  }
  0x9b   :  { %2189 = vmatpush2.bf16.msra.mxu0 %v4871_v9  ;;  %2230 = vmatpush2.bf16.msra.mxu1 %v4874_v10 }
  0x9c   :  { %2190 = vmatprep.subr.bf16.mxu0 %v4879_v11  ;;  %2231 = vmatprep.subr.bf16.mxu1 %v4882_v12  ;;  %v4918_v11 = vld [vmem:[#allocation6 + $0x6a4] ss:$16 sps:$4 sm:$0xff]  }
  0x9f   :  { %2191 = vmatpush2.bf16.msra.mxu0 %v4877_v13  ;;  %2232 = vmatpush2.bf16.msra.mxu1 %v4880_v14 }
  0xa0   :  { %2192 = vmatprep.subr.bf16.mxu0 %v4885_v15  ;;  %2233 = vmatprep.subr.bf16.mxu1 %v4888_v16 }
  0xa3   :  { %2193 = vmatpush2.bf16.msra.mxu0 %v4883_v17  ;;  %2234 = vmatpush2.bf16.msra.mxu1 %v4886_v18  ;;  %v4913_v18 = vld [vmem:[#allocation6 + $0x4a0] ss:$16 sps:$4 sm:$0xff]  }
  0xa4   :  { %2194 = vmatprep.subr.bf16.mxu0 %v4891_v19  ;;  %2235 = vmatprep.subr.bf16.mxu1 %v4894_v20  ;;  %v4916_v19 = vld [vmem:[#allocation6 + $0x6a0] ss:$16 sps:$4 sm:$0xff]  }
  0xa7   :  { %2195 = vmatpush2.bf16.msra.mxu0 %v4889_v21  ;;  %2236 = vmatpush2.bf16.msra.mxu1 %v4892_v22 }
  0xa8   :  { %2196 = vmatprep.subr.bf16.mxu0 %v4897_v23  ;;  %2237 = vmatprep.subr.bf16.mxu1 %v4900_v24  ;;  %v4921_v24 = vld [vmem:[#allocation6 + $0x484] ss:$16 sps:$4 sm:$0xff]  }
  0xab   :  { %2197 = vmatpush2.bf16.msra.mxu0 %v4895_v25  ;;  %2238 = vmatpush2.bf16.msra.mxu1 %v4898_v26  ;;  %v4924_v25 = vld [vmem:[#allocation6 + $0x684] ss:$16 sps:$4 sm:$0xff]  }
  0xac   :  { %2248 = vmatprep.subr.bf16.mxu0 %v4903_v27  ;;  %2289 = vmatprep.subr.bf16.mxu1 %v4906_v28  ;;  %v4919_v28 = vld [vmem:[#allocation6 + $0x480] ss:$16 sps:$4 sm:$0xff]  }
 0x11e   :  { %v372_v40 = vpop.f32.mrf.mxu0  ;;  %v413_v41 = vpop.f32.mrf.mxu1 }
 0x11f   :  { %v373_v42 = vadd.f32 %v372_v40, %v157_v36  ;;  %v414_v43 = vadd.f32 %v413_v41, %v165_v37  ;;  %v4922_v37 = vld [vmem:[#allocation6 + $0x680] ss:$16 sps:$4 sm:$0xff]  }
 0x120   :  { %v374_v44 = vpop.f32.mrf.mxu0  ;;  %v415_v45 = vpop.f32.mrf.mxu1 }
 0x121   :  { %v586_v47 = vmax.f32 %v414_v43, 0.0  ;;  %v375_v48 = vadd.f32 %v374_v44, %v161_v38  ;;  %v416_v49 = vadd.f32 %v415_v45, %v169_v39  ;;  %v584_v51 = vmax.f32 %v373_v42, 0.0  ;;  %v4927_v38 = vld [vmem:[#allocation6 + $0x464] ss:$16 sps:$4 sm:$0xff]   ;;  %v4925_v42 = vld [vmem:[#allocation6 + $0x460] ss:$16 sps:$4 sm:$0xff]  }
 0x122   :  { %v376_v52 = vpop.f32.mrf.mxu0  ;;  %v417_v53 = vpop.f32.mrf.mxu1  ;;  %v4930_v39 = vld [vmem:[#allocation6 + $0x664] ss:$16 sps:$4 sm:$0xff]   ;;  %v4928_v43 = vld [vmem:[#allocation6 + $0x660] ss:$16 sps:$4 sm:$0xff]  }
 0x123   :  { %v585_v54 = vmax.f32 %v375_v48, 0.0  ;;  %v587_v55 = vmax.f32 %v416_v49, 0.0  ;;  %v5718_v58 = vpack.c.bf16 %v586_v47, %v586_v47  ;;  %v5726_v3 = vpack.c.bf16 %v584_v51, %v584_v51  ;;  %v4936_v47 = vld [vmem:[#allocation6 + $0x644] ss:$16 sps:$4 sm:$0xff]   ;;  %v4931_v48 = vld [vmem:[#allocation6 + $0x440] ss:$16 sps:$4 sm:$0xff]  }
 0x124   :  { %v377_v59 = vpop.f32.mrf.mxu0  ;;  %v418_v60 = vpop.f32.mrf.mxu1  ;;  %v4934_v49 = vld [vmem:[#allocation6 + $0x640] ss:$16 sps:$4 sm:$0xff]   ;;  %v4942_v51 = vld [vmem:[#allocation6 + $0x624] ss:$16 sps:$4 sm:$0xff]  }
 0x125   :  { %v5720_v63 = vpack.c.bf16 %v585_v54, %v585_v54  ;;  %v5722_v0 = vpack.c.bf16 %v587_v55, %v587_v55  ;;  %v4937_v52 = vld [vmem:[#allocation6 + $0x420] ss:$16 sps:$4 sm:$0xff]   ;;  %v4945_v54 = vld [vmem:[#allocation6 + $0x404] ss:$16 sps:$4 sm:$0xff]  }
 0x126   :  { %v5728_v4 = vpop.f32.mrf.mxu0  ;;  %v5730_v5 = vpop.f32.mrf.mxu1  ;;  %v4940_v53 = vld [vmem:[#allocation6 + $0x620] ss:$16 sps:$4 sm:$0xff]   ;;  %v4948_v55 = vld [vmem:[#allocation6 + $0x604] ss:$16 sps:$4 sm:$0xff]  }
 0x127   :  { %2198 = vmatprep.mubr.bf16.mxu0 %v5720_v63  ;;  %2239 = vmatprep.mubr.bf16.mxu1 %v5722_v0  ;;  %v4951_v59 = vld [vmem:[#allocation6 + $0x5e4] ss:$16 sps:$4 sm:$0xff]  }
 0x128   :  { %2199 = vmatmul.mubr.bf16.vlgmr.msra.gmra.mxu0 %v5726_v3  ;;  %2240 = vmatmul.mubr.bf16.vlgmr.msra.gmra.mxu1 %v5718_v58  ;;  %v456_v9 = vpop.f32.mrf.mxu0  ;;  %v497_v10 = vpop.f32.mrf.mxu1  ;;  %v4954_v60 = vld [vmem:[#allocation6 + $0x7e4] ss:$16 sps:$4 sm:$0xff]  }
 0x129   :  { %2249 = vmatpush1.bf16.msra.mxu0 %v4901_v56  ;;  %2290 = vmatpush1.bf16.msra.mxu1 %v4904_v57  ;;  %v457_v12 = vadd.f32 %v456_v9, %v177_v1  ;;  %v498_v13 = vadd.f32 %v497_v10, %v185_v2  ;;  %v4943_v56 = vld [vmem:[#allocation6 + $0x400] ss:$16 sps:$4 sm:$0xff]   ;;  %v4957_v1 = vld [vmem:[#allocation6 + $0x5c4] ss:$16 sps:$4 sm:$0xff]  }
 0x12a   :  { %2250 = vmatprep.subr.bf16.mxu0 %v4909_v61  ;;  %2291 = vmatprep.subr.bf16.mxu1 %v4912_v62  ;;  %v458_v14 = vpop.f32.mrf.mxu0  ;;  %v499_v15 = vpop.f32.mrf.mxu1  ;;  %v4946_v57 = vld [vmem:[#allocation6 + $0x600] ss:$16 sps:$4 sm:$0xff]   ;;  %v4960_v2 = vld [vmem:[#allocation6 + $0x7c4] ss:$16 sps:$4 sm:$0xff]  }
 0x12b   :  { %v589_v16 = vmax.f32 %v457_v12, 0.0  ;;  %v591_v17 = vmax.f32 %v498_v13, 0.0  ;;  %v4949_v61 = vld [vmem:[#allocation6 + $0x5e0] ss:$16 sps:$4 sm:$0xff]   ;;  %v4966_v9 = vld [vmem:[#allocation6 + $0x7a4] ss:$16 sps:$4 sm:$0xff]  }
 0x12c   :  { %v459_v20 = vpop.f32.mrf.mxu0  ;;  %v500_v21 = vpop.f32.mrf.mxu1  ;;  %v4952_v62 = vld [vmem:[#allocation6 + $0x7e0] ss:$16 sps:$4 sm:$0xff]   ;;  %v4969_v12 = vld [vmem:[#allocation6 + $0x584] ss:$16 sps:$4 sm:$0xff]  }
 0x12d   :  { %2251 = vmatpush1.bf16.msra.mxu0 %v4907_v6  ;;  %2292 = vmatpush1.bf16.msra.mxu1 %v4910_v7  ;;  %v5736_v22 = vpack.c.bf16 %v589_v16, %v589_v16  ;;  %v5738_v23 = vpack.c.bf16 %v591_v17, %v591_v17  ;;  %v4955_v6 = vld [vmem:[#allocation6 + $0x5c0] ss:$16 sps:$4 sm:$0xff]   ;;  %v4972_v13 = vld [vmem:[#allocation6 + $0x784] ss:$16 sps:$4 sm:$0xff]   ;;  %v180_v20 = vsub.s32 6, %v5689_v30  ;;  %v172_v21 = vsub.s32 4, %v5689_v30 }
 0x12e   :  { %2252 = vmatprep.subr.bf16.mxu0 %v4915_v8  ;;  %2293 = vmatprep.subr.bf16.mxu1 %v4918_v11  ;;  %v5740_v26 = vpop.f32.mrf.mxu0  ;;  %v5742_v27 = vpop.f32.mrf.mxu1  ;;  %v4958_v7 = vld [vmem:[#allocation6 + $0x7c0] ss:$16 sps:$4 sm:$0xff]   ;;  %v4963_v8 = vld [vmem:[#allocation6 + $0x5a4] ss:$16 sps:$4 sm:$0xff]  }
 0x12f   :  { %2280 = vmatprep.mubr.bf16.mxu0 %v5736_v22  ;;  %2321 = vmatprep.mubr.bf16.mxu1 %v5738_v23  ;;  %v4961_v10 = vld [vmem:[#allocation6 + $0x5a0] ss:$16 sps:$4 sm:$0xff]   ;;  %v4975_v16 = vld [vmem:[#allocation6 + $0x564] ss:$16 sps:$4 sm:$0xff]  }
 0x130   :  { %v5746_v29 = vpop.f32.mrf.mxu0  ;;  %v5748_v36 = vpop.f32.mrf.mxu1  ;;  %v4964_v11 = vld [vmem:[#allocation6 + $0x7a0] ss:$16 sps:$4 sm:$0xff]   ;;  %v4978_v17 = vld [vmem:[#allocation6 + $0x764] ss:$16 sps:$4 sm:$0xff]  }
 0x131   :  { %2253 = vmatpush1.bf16.msra.mxu0 %v4913_v18  ;;  %2294 = vmatpush1.bf16.msra.mxu1 %v4916_v19  ;;  %v4967_v14 = vld [vmem:[#allocation6 + $0x580] ss:$16 sps:$4 sm:$0xff]  }
 0x132   :  { %2254 = vmatprep.subr.bf16.mxu0 %v4921_v24  ;;  %2295 = vmatprep.subr.bf16.mxu1 %v4924_v25  ;;  %v540_v40 = vpop.f32.mrf.mxu0  ;;  %v581_v41 = vpop.f32.mrf.mxu1  ;;  %v4970_v15 = vld [vmem:[#allocation6 + $0x780] ss:$16 sps:$4 sm:$0xff]   ;;  %v4981_v24 = vld [vmem:[#allocation6 + $0x544] ss:$16 sps:$4 sm:$0xff]  }
 0x133   :  { %v4973_v18 = vld [vmem:[#allocation6 + $0x560] ss:$16 sps:$4 sm:$0xff]   ;;  %v4984_v25 = vld [vmem:[#allocation6 + $0x744] ss:$16 sps:$4 sm:$0xff]  }
 0x134   :  { %v541_v44 = vpop.f32.mrf.mxu0  ;;  %v582_v45 = vpop.f32.mrf.mxu1  ;;  %v4976_v19 = vld [vmem:[#allocation6 + $0x760] ss:$16 sps:$4 sm:$0xff]   ;;  %v4987_v40 = vld [vmem:[#allocation6 + $0x524] ss:$16 sps:$4 sm:$0xff]  }
 0x135   :  { %2255 = vmatpush1.bf16.msra.mxu0 %v4919_v28  ;;  %2296 = vmatpush1.bf16.msra.mxu1 %v4922_v37  ;;  %v181_v28 = vrot.slane %v5694_v31, %v180_v20  ;;  %v4979_v37 = vld [vmem:[#allocation6 + $0x540] ss:$16 sps:$4 sm:$0xff]   ;;  %v4990_v41 = vld [vmem:[#allocation6 + $0x724] ss:$16 sps:$4 sm:$0xff]   ;;  %v5039_v20 = vld [vmem:[#allocation6 + $0x8] ss:$16 sps:$4 sm:$0xff]  }
 0x136   :  { %2256 = vmatprep.subr.bf16.mxu0 %v4927_v38  ;;  %2297 = vmatprep.subr.bf16.mxu1 %v4930_v39  ;;  %v4982_v38 = vld [vmem:[#allocation6 + $0x740] ss:$16 sps:$4 sm:$0xff]   ;;  %v173_v39 = vrot.slane %v5694_v31, %v172_v21  ;;  %v4993_v45 = vld [vmem:[#allocation6 + $0x504] ss:$16 sps:$4 sm:$0xff]   ;;  %v5042_v21 = vld [vmem:[#allocation6 + $0x208] ss:$16 sps:$4 sm:$0xff]  }
 0x137   :  { %v4988_v44 = vld [vmem:[#allocation6 + $0x720] ss:$16 sps:$4 sm:$0xff]  }
 0x138   :  { %v455_v30 = vadd.f32 %v5728_v4, %v173_v39  ;;  %v5056_v39 = vld [vmem:[#allocation6 + $0x3cc] ss:$16 sps:$4 sm:$0xff]  }
 0x139   :  { %2257 = vmatpush1.bf16.msra.mxu0 %v4925_v42  ;;  %2298 = vmatpush1.bf16.msra.mxu1 %v4928_v43  ;;  %v496_v42 = vadd.f32 %v5730_v5, %v181_v28  ;;  %v4985_v43 = vld [vmem:[#allocation6 + $0x520] ss:$16 sps:$4 sm:$0xff]   ;;  %v5002_v5 = vld [vmem:[#allocation6 + $0x2ec] ss:$16 sps:$4 sm:$0xff]   ;;  %v5045_v28 = vld [vmem:[#allocation6 + $0x1e8] ss:$16 sps:$4 sm:$0xff]  }
 0x13a   :  { %2258 = vmatprep.subr.bf16.mxu0 %v4933_v46  ;;  %2299 = vmatprep.subr.bf16.mxu1 %v4936_v47  ;;  %v4996_v46 = vld [vmem:[#allocation6 + $0x704] ss:$16 sps:$4 sm:$0xff]   ;;  %v588_v31 = vmax.f32 %v455_v30, 0.0  ;;  %v5060_v30 = vld [vmem:[#allocation6 + $0x3a8] ss:$16 sps:$4 sm:$0xff]  }
 0x13b   :  { %v590_v47 = vmax.f32 %v496_v42, 0.0  ;;  %v5059_v42 = vld [vmem:[#allocation6 + $0x1ac] ss:$16 sps:$4 sm:$0xff]  }
 0x13c   :  { %v5758_v4 = vpack.c.bf16 %v588_v31, %v588_v31  ;;  %v5074_v31 = vld [vmem:[#allocation6 + $0x36c] ss:$16 sps:$4 sm:$0xff]  }
 0x13d   :  { %2259 = vmatpush1.bf16.msra.mxu0 %v4931_v48  ;;  %2300 = vmatpush1.bf16.msra.mxu1 %v4934_v49  ;;  %v4991_v48 = vld [vmem:[#allocation6 + $0x500] ss:$16 sps:$4 sm:$0xff]  }
 0x13e   :  { %2260 = vmatprep.subr.bf16.mxu0 %v4939_v50  ;;  %2301 = vmatprep.subr.bf16.mxu1 %v4942_v51  ;;  %v4994_v49 = vld [vmem:[#allocation6 + $0x700] ss:$16 sps:$4 sm:$0xff]   ;;  %v4999_v50 = vld [vmem:[#allocation6 + $0xec] ss:$16 sps:$4 sm:$0xff]   ;;  %v4997_v51 = vld [vmem:[#allocation6 + $0xe8] ss:$16 sps:$4 sm:$0xff]  }
 0x141   :  { %2261 = vmatpush1.bf16.msra.mxu0 %v4937_v52  ;;  %2302 = vmatpush1.bf16.msra.mxu1 %v4940_v53  ;;  %v5756_v52 = vpack.c.bf16 %v590_v47, %v590_v47  ;;  %v5000_v53 = vld [vmem:[#allocation6 + $0x2e8] ss:$16 sps:$4 sm:$0xff]  }
 0x142   :  { %2262 = vmatprep.subr.bf16.mxu0 %v4945_v54  ;;  %2303 = vmatprep.subr.bf16.mxu1 %v4948_v55  ;;  %v5005_v54 = vld [vmem:[#allocation6 + $0xcc] ss:$16 sps:$4 sm:$0xff]   ;;  %v5063_v47 = vld [vmem:[#allocation6 + $0x188] ss:$16 sps:$4 sm:$0xff]  }
 0x143   :  { %v5008_v55 = vld [vmem:[#allocation6 + $0x2cc] ss:$16 sps:$4 sm:$0xff]  }
 0x145   :  { %2263 = vmatpush1.bf16.msra.mxu0 %v4943_v56  ;;  %2304 = vmatpush1.bf16.msra.mxu1 %v4946_v57  ;;  %v5003_v56 = vld [vmem:[#allocation6 + $0xc8] ss:$16 sps:$4 sm:$0xff]  }
 0x146   :  { %2264 = vmatprep.subr.bf16.mxu0 %v4951_v59  ;;  %2305 = vmatprep.subr.bf16.mxu1 %v4954_v60  ;;  %v5006_v57 = vld [vmem:[#allocation6 + $0x2c8] ss:$16 sps:$4 sm:$0xff]   ;;  %v5011_v59 = vld [vmem:[#allocation6 + $0xac] ss:$16 sps:$4 sm:$0xff]  }
 0x147   :  { %v5014_v60 = vld [vmem:[#allocation6 + $0x2ac] ss:$16 sps:$4 sm:$0xff]  }
 0x149   :  { %2265 = vmatpush2.bf16.msra.mxu0 %v4949_v61  ;;  %2306 = vmatpush2.bf16.msra.mxu1 %v4952_v62  ;;  %v5009_v61 = vld [vmem:[#allocation6 + $0xa8] ss:$16 sps:$4 sm:$0xff]  }
 0x14a   :  { %2266 = vmatprep.subr.bf16.mxu0 %v4957_v1  ;;  %2307 = vmatprep.subr.bf16.mxu1 %v4960_v2  ;;  %v5012_v62 = vld [vmem:[#allocation6 + $0x2a8] ss:$16 sps:$4 sm:$0xff]   ;;  %v5017_v1 = vld [vmem:[#allocation6 + $0x8c] ss:$16 sps:$4 sm:$0xff]  }
 0x14b   :  { %v5020_v2 = vld [vmem:[#allocation6 + $0x28c] ss:$16 sps:$4 sm:$0xff]  }
 0x14d   :  { %2267 = vmatpush2.bf16.msra.mxu0 %v4955_v6  ;;  %2308 = vmatpush2.bf16.msra.mxu1 %v4958_v7  ;;  %v5015_v6 = vld [vmem:[#allocation6 + $0x88] ss:$16 sps:$4 sm:$0xff]   ;;  %v5023_v7 = vld [vmem:[#allocation6 + $0x6c] ss:$16 sps:$4 sm:$0xff]  }
 0x14e   :  { %2268 = vmatprep.subr.bf16.mxu0 %v4963_v8  ;;  %2309 = vmatprep.subr.bf16.mxu1 %v4966_v9  ;;  %v5021_v8 = vld [vmem:[#allocation6 + $0x68] ss:$16 sps:$4 sm:$0xff]  }
 0x14f   :  { %v5024_v9 = vld [vmem:[#allocation6 + $0x268] ss:$16 sps:$4 sm:$0xff]  }
 0x151   :  { %2269 = vmatpush2.bf16.msra.mxu0 %v4961_v10  ;;  %2310 = vmatpush2.bf16.msra.mxu1 %v4964_v11  ;;  %v5029_v10 = vld [vmem:[#allocation6 + $0x4c] ss:$16 sps:$4 sm:$0xff]  }
 0x152   :  { %2270 = vmatprep.subr.bf16.mxu0 %v4969_v12  ;;  %2311 = vmatprep.subr.bf16.mxu1 %v4972_v13  ;;  %v5032_v11 = vld [vmem:[#allocation6 + $0x24c] ss:$16 sps:$4 sm:$0xff]   ;;  %v5027_v12 = vld [vmem:[#allocation6 + $0x48] ss:$16 sps:$4 sm:$0xff]  }
 0x153   :  { %v5030_v13 = vld [vmem:[#allocation6 + $0x248] ss:$16 sps:$4 sm:$0xff]  }
 0x155   :  { %2271 = vmatpush2.bf16.msra.mxu0 %v4967_v14  ;;  %2312 = vmatpush2.bf16.msra.mxu1 %v4970_v15  ;;  %v5035_v14 = vld [vmem:[#allocation6 + $0x2c] ss:$16 sps:$4 sm:$0xff]  }
 0x156   :  { %2272 = vmatprep.subr.bf16.mxu0 %v4975_v16  ;;  %2313 = vmatprep.subr.bf16.mxu1 %v4978_v17  ;;  %v5038_v15 = vld [vmem:[#allocation6 + $0x22c] ss:$16 sps:$4 sm:$0xff]   ;;  %v5033_v16 = vld [vmem:[#allocation6 + $0x28] ss:$16 sps:$4 sm:$0xff]  }
 0x157   :  { %v5036_v17 = vld [vmem:[#allocation6 + $0x228] ss:$16 sps:$4 sm:$0xff]  }
 0x159   :  { %2273 = vmatpush2.bf16.msra.mxu0 %v4973_v18  ;;  %2314 = vmatpush2.bf16.msra.mxu1 %v4976_v19  ;;  %v5041_v18 = vld [vmem:[#allocation6 + $0xc] ss:$16 sps:$4 sm:$0xff]  }
 0x15a   :  { %2274 = vmatprep.subr.bf16.mxu0 %v4981_v24  ;;  %2315 = vmatprep.subr.bf16.mxu1 %v4984_v25  ;;  %v5044_v19 = vld [vmem:[#allocation6 + $0x20c] ss:$16 sps:$4 sm:$0xff]  }
 0x15b   :  { %v5047_v24 = vld [vmem:[#allocation6 + $0x1ec] ss:$16 sps:$4 sm:$0xff]  }
 0x15c   :  { %v5050_v25 = vld [vmem:[#allocation6 + $0x3ec] ss:$16 sps:$4 sm:$0xff]  }
 0x15d   :  { %2275 = vmatpush2.bf16.msra.mxu0 %v4979_v37  ;;  %2316 = vmatpush2.bf16.msra.mxu1 %v4982_v38  ;;  %v5048_v37 = vld [vmem:[#allocation6 + $0x3e8] ss:$16 sps:$4 sm:$0xff]   ;;  %v5053_v38 = vld [vmem:[#allocation6 + $0x1cc] ss:$16 sps:$4 sm:$0xff]  }
 0x15e   :  { %2276 = vmatprep.subr.bf16.mxu0 %v4987_v40  ;;  %2317 = vmatprep.subr.bf16.mxu1 %v4990_v41  ;;  %v5051_v40 = vld [vmem:[#allocation6 + $0x1c8] ss:$16 sps:$4 sm:$0xff]  }
 0x15f   :  { %v5054_v41 = vld [vmem:[#allocation6 + $0x3c8] ss:$16 sps:$4 sm:$0xff]  }
 0x161   :  { %2277 = vmatpush2.bf16.msra.mxu0 %v4985_v43  ;;  %2318 = vmatpush2.bf16.msra.mxu1 %v4988_v44  ;;  %v5062_v43 = vld [vmem:[#allocation6 + $0x3ac] ss:$16 sps:$4 sm:$0xff]   ;;  %v5057_v44 = vld [vmem:[#allocation6 + $0x1a8] ss:$16 sps:$4 sm:$0xff]  }
 0x162   :  { %2278 = vmatprep.subr.bf16.mxu0 %v4993_v45  ;;  %2319 = vmatprep.subr.bf16.mxu1 %v4996_v46  ;;  %v5065_v45 = vld [vmem:[#allocation6 + $0x18c] ss:$16 sps:$4 sm:$0xff]  }
 0x163   :  { %v5068_v46 = vld [vmem:[#allocation6 + $0x38c] ss:$16 sps:$4 sm:$0xff]  }
 0x165   :  { %2279 = vmatpush2.bf16.msra.mxu0 %v4991_v48  ;;  %2320 = vmatpush2.bf16.msra.mxu1 %v4994_v49  ;;  %v5066_v48 = vld [vmem:[#allocation6 + $0x388] ss:$16 sps:$4 sm:$0xff]   ;;  %v5071_v49 = vld [vmem:[#allocation6 + $0x16c] ss:$16 sps:$4 sm:$0xff]  }
 0x166   :  { %2330 = vmatprep.subr.bf16.mxu0 %v4999_v50  ;;  %2371 = vmatprep.subr.bf16.mxu1 %v5002_v5  ;;  %v5069_v50 = vld [vmem:[#allocation6 + $0x168] ss:$16 sps:$4 sm:$0xff]  }
 0x167   :  { %v5072_v5 = vld [vmem:[#allocation6 + $0x368] ss:$16 sps:$4 sm:$0xff]  }
 0x168   :  { %2281 = vmatmul.mubr.bf16.vlgmr.msra.gmra.mxu0 %v5758_v4  ;;  %2322 = vmatmul.mubr.bf16.vlgmr.msra.gmra.mxu1 %v5756_v52 }
 0x169   :  { %2331 = vmatpush1.bf16.msra.mxu0 %v4997_v51  ;;  %2362 = vmatprep.mubr.bf16.mxu0 %v5720_v63  ;;  %v5018_v63 = vld [vmem:[#allocation6 + $0x288] ss:$16 sps:$4 sm:$0xff]   ;;  %v5077_v51 = vld [vmem:[#allocation6 + $0x14c] ss:$16 sps:$4 sm:$0xff]  }
 0x16a   :  { %2372 = vmatpush1.bf16.msra.mxu1 %v5000_v53  ;;  %2403 = vmatprep.mubr.bf16.mxu1 %v5722_v0  ;;  %v5026_v0 = vld [vmem:[#allocation6 + $0x26c] ss:$16 sps:$4 sm:$0xff]  }
 0x16b   :  { %2332 = vmatprep.subr.bf16.mxu0 %v5005_v54  ;;  %2373 = vmatprep.subr.bf16.mxu1 %v5008_v55  ;;  %v5080_v53 = vld [vmem:[#allocation6 + $0x34c] ss:$16 sps:$4 sm:$0xff]   ;;  %v5075_v54 = vld [vmem:[#allocation6 + $0x148] ss:$16 sps:$4 sm:$0xff]  }
 0x16c   :  { %v5078_v55 = vld [vmem:[#allocation6 + $0x348] ss:$16 sps:$4 sm:$0xff]  }
 0x16d   :  { %2333 = vmatpush1.bf16.msra.mxu0 %v5003_v56  ;;  %v5083_v56 = vld [vmem:[#allocation6 + $0x12c] ss:$16 sps:$4 sm:$0xff]  }
 0x16e   :  { %2374 = vmatpush1.bf16.msra.mxu1 %v5006_v57  ;;  %2334 = vmatprep.subr.bf16.mxu0 %v5011_v59  ;;  %v5086_v57 = vld [vmem:[#allocation6 + $0x32c] ss:$16 sps:$4 sm:$0xff]   ;;  %v5081_v59 = vld [vmem:[#allocation6 + $0x128] ss:$16 sps:$4 sm:$0xff]  }
 0x16f   :  { %2375 = vmatprep.subr.bf16.mxu1 %v5014_v60  ;;  %v5084_v60 = vld [vmem:[#allocation6 + $0x328] ss:$16 sps:$4 sm:$0xff]  }
 0x171   :  { %2335 = vmatpush1.bf16.msra.mxu0 %v5009_v61  ;;  %v5089_v61 = vld [vmem:[#allocation6 + $0x10c] ss:$16 sps:$4 sm:$0xff]  }
 0x172   :  { %2376 = vmatpush1.bf16.msra.mxu1 %v5012_v62  ;;  %2336 = vmatprep.subr.bf16.mxu0 %v5017_v1  ;;  %v5092_v62 = vld [vmem:[#allocation6 + $0x30c] ss:$16 sps:$4 sm:$0xff]   ;;  %v5087_v1 = vld [vmem:[#allocation6 + $0x108] ss:$16 sps:$4 sm:$0xff]  }
 0x173   :  { %2377 = vmatprep.subr.bf16.mxu1 %v5020_v2  ;;  %v5090_v2 = vld [vmem:[#allocation6 + $0x308] ss:$16 sps:$4 sm:$0xff]  }
 0x175   :  { %2337 = vmatpush1.bf16.msra.mxu0 %v5015_v6  ;;  %v5095_v6 = vld [vmem:[#allocation6 + $0x4ec] ss:$16 sps:$4 sm:$0xff]  }
 0x176   :  { %2378 = vmatpush1.bf16.msra.mxu1 %v5018_v63  ;;  %2338 = vmatprep.subr.bf16.mxu0 %v5023_v7  ;;  %v5098_v63 = vld [vmem:[#allocation6 + $0x6ec] ss:$16 sps:$4 sm:$0xff]   ;;  %v5093_v7 = vld [vmem:[#allocation6 + $0x4e8] ss:$16 sps:$4 sm:$0xff]  }
 0x177   :  { %2379 = vmatprep.subr.bf16.mxu1 %v5026_v0  ;;  %v5096_v0 = vld [vmem:[#allocation6 + $0x6e8] ss:$16 sps:$4 sm:$0xff]  }
 0x179   :  { %2339 = vmatpush1.bf16.msra.mxu0 %v5021_v8  ;;  %v5101_v8 = vld [vmem:[#allocation6 + $0x4cc] ss:$16 sps:$4 sm:$0xff]  }
 0x17a   :  { %2380 = vmatpush1.bf16.msra.mxu1 %v5024_v9  ;;  %2340 = vmatprep.subr.bf16.mxu0 %v5029_v10  ;;  %v5104_v9 = vld [vmem:[#allocation6 + $0x6cc] ss:$16 sps:$4 sm:$0xff]   ;;  %v5099_v10 = vld [vmem:[#allocation6 + $0x4c8] ss:$16 sps:$4 sm:$0xff]  }
 0x17b   :  { %2381 = vmatprep.subr.bf16.mxu1 %v5032_v11  ;;  %v5102_v11 = vld [vmem:[#allocation6 + $0x6c8] ss:$16 sps:$4 sm:$0xff]  }
 0x17d   :  { %2341 = vmatpush1.bf16.msra.mxu0 %v5027_v12  ;;  %v5107_v12 = vld [vmem:[#allocation6 + $0x4ac] ss:$16 sps:$4 sm:$0xff]  }
 0x17e   :  { %2382 = vmatpush1.bf16.msra.mxu1 %v5030_v13  ;;  %2342 = vmatprep.subr.bf16.mxu0 %v5035_v14  ;;  %v5110_v13 = vld [vmem:[#allocation6 + $0x6ac] ss:$16 sps:$4 sm:$0xff]   ;;  %v5105_v14 = vld [vmem:[#allocation6 + $0x4a8] ss:$16 sps:$4 sm:$0xff]  }
 0x17f   :  { %2383 = vmatprep.subr.bf16.mxu1 %v5038_v15  ;;  %v5113_v15 = vld [vmem:[#allocation6 + $0x48c] ss:$16 sps:$4 sm:$0xff]  }
 0x181   :  { %2343 = vmatpush1.bf16.msra.mxu0 %v5033_v16  ;;  %v5111_v16 = vld [vmem:[#allocation6 + $0x488] ss:$16 sps:$4 sm:$0xff]  }
 0x182   :  { %2384 = vmatpush1.bf16.msra.mxu1 %v5036_v17  ;;  %2344 = vmatprep.subr.bf16.mxu0 %v5041_v18  ;;  %v5119_v17 = vld [vmem:[#allocation6 + $0x46c] ss:$16 sps:$4 sm:$0xff]  }
 0x183   :  { %2385 = vmatprep.subr.bf16.mxu1 %v5044_v19  ;;  %v5122_v18 = vld [vmem:[#allocation6 + $0x66c] ss:$16 sps:$4 sm:$0xff]   ;;  %v5120_v19 = vld [vmem:[#allocation6 + $0x668] ss:$16 sps:$4 sm:$0xff]  }
 0x185   :  { %2345 = vmatpush1.bf16.msra.mxu0 %v5039_v20  ;;  %v5125_v20 = vld [vmem:[#allocation6 + $0x44c] ss:$16 sps:$4 sm:$0xff]  }
 0x186   :  { %2386 = vmatpush1.bf16.msra.mxu1 %v5042_v21  ;;  %2346 = vmatprep.subr.bf16.mxu0 %v5047_v24  ;;  %v5128_v21 = vld [vmem:[#allocation6 + $0x64c] ss:$16 sps:$4 sm:$0xff]   ;;  %v5123_v24 = vld [vmem:[#allocation6 + $0x448] ss:$16 sps:$4 sm:$0xff]  }
 0x187   :  { %2387 = vmatprep.subr.bf16.mxu1 %v5050_v25  ;;  %v5126_v25 = vld [vmem:[#allocation6 + $0x648] ss:$16 sps:$4 sm:$0xff]  }
 0x189   :  { %2347 = vmatpush2.bf16.msra.mxu0 %v5045_v28  ;;  %v5131_v28 = vld [vmem:[#allocation6 + $0x42c] ss:$16 sps:$4 sm:$0xff]  }
 0x18a   :  { %2388 = vmatpush2.bf16.msra.mxu1 %v5048_v37  ;;  %2348 = vmatprep.subr.bf16.mxu0 %v5053_v38  ;;  %v5134_v37 = vld [vmem:[#allocation6 + $0x62c] ss:$16 sps:$4 sm:$0xff]   ;;  %v5129_v38 = vld [vmem:[#allocation6 + $0x428] ss:$16 sps:$4 sm:$0xff]  }
 0x18b   :  { %2389 = vmatprep.subr.bf16.mxu1 %v5056_v39  ;;  %v5132_v39 = vld [vmem:[#allocation6 + $0x628] ss:$16 sps:$4 sm:$0xff]  }
 0x18d   :  { %2349 = vmatpush2.bf16.msra.mxu0 %v5051_v40  ;;  %v5137_v40 = vld [vmem:[#allocation6 + $0x40c] ss:$16 sps:$4 sm:$0xff]  }
 0x18e   :  { %2390 = vmatpush2.bf16.msra.mxu1 %v5054_v41  ;;  %2350 = vmatprep.subr.bf16.mxu0 %v5059_v42  ;;  %v5140_v41 = vld [vmem:[#allocation6 + $0x60c] ss:$16 sps:$4 sm:$0xff]   ;;  %v5135_v42 = vld [vmem:[#allocation6 + $0x408] ss:$16 sps:$4 sm:$0xff]  }
 0x18f   :  { %2391 = vmatprep.subr.bf16.mxu1 %v5062_v43  ;;  %v5138_v43 = vld [vmem:[#allocation6 + $0x608] ss:$16 sps:$4 sm:$0xff]  }
 0x191   :  { %2351 = vmatpush2.bf16.msra.mxu0 %v5057_v44  ;;  %v5143_v44 = vld [vmem:[#allocation6 + $0x5ec] ss:$16 sps:$4 sm:$0xff]  }
 0x192   :  { %2392 = vmatpush2.bf16.msra.mxu1 %v5060_v30  ;;  %2352 = vmatprep.subr.bf16.mxu0 %v5065_v45  ;;  %v5146_v30 = vld [vmem:[#allocation6 + $0x7ec] ss:$16 sps:$4 sm:$0xff]   ;;  %v5141_v45 = vld [vmem:[#allocation6 + $0x5e8] ss:$16 sps:$4 sm:$0xff]  }
 0x193   :  { %2393 = vmatprep.subr.bf16.mxu1 %v5068_v46  ;;  %v5144_v46 = vld [vmem:[#allocation6 + $0x7e8] ss:$16 sps:$4 sm:$0xff]  }
 0x195   :  { %2353 = vmatpush2.bf16.msra.mxu0 %v5063_v47  ;;  %v5149_v47 = vld [vmem:[#allocation6 + $0x5cc] ss:$16 sps:$4 sm:$0xff]  }
 0x196   :  { %2394 = vmatpush2.bf16.msra.mxu1 %v5066_v48  ;;  %2354 = vmatprep.subr.bf16.mxu0 %v5071_v49  ;;  %v5152_v48 = vld [vmem:[#allocation6 + $0x7cc] ss:$16 sps:$4 sm:$0xff]   ;;  %v5147_v49 = vld [vmem:[#allocation6 + $0x5c8] ss:$16 sps:$4 sm:$0xff]  }
 0x197   :  { %2395 = vmatprep.subr.bf16.mxu1 %v5074_v31  ;;  %v5150_v31 = vld [vmem:[#allocation6 + $0x7c8] ss:$16 sps:$4 sm:$0xff]  }
 0x199   :  { %2355 = vmatpush2.bf16.msra.mxu0 %v5069_v50  ;;  %v5155_v50 = vld [vmem:[#allocation6 + $0x5ac] ss:$16 sps:$4 sm:$0xff]  }
 0x19a   :  { %2396 = vmatpush2.bf16.msra.mxu1 %v5072_v5  ;;  %2356 = vmatprep.subr.bf16.mxu0 %v5077_v51  ;;  %v5158_v5 = vld [vmem:[#allocation6 + $0x7ac] ss:$16 sps:$4 sm:$0xff]   ;;  %v5153_v51 = vld [vmem:[#allocation6 + $0x5a8] ss:$16 sps:$4 sm:$0xff]  }
 0x19b   :  { %2397 = vmatprep.subr.bf16.mxu1 %v5080_v53  ;;  %v5156_v53 = vld [vmem:[#allocation6 + $0x7a8] ss:$16 sps:$4 sm:$0xff]  }
 0x19d   :  { %2357 = vmatpush2.bf16.msra.mxu0 %v5075_v54  ;;  %v5161_v54 = vld [vmem:[#allocation6 + $0x58c] ss:$16 sps:$4 sm:$0xff]  }
 0x19e   :  { %2398 = vmatpush2.bf16.msra.mxu1 %v5078_v55  ;;  %2358 = vmatprep.subr.bf16.mxu0 %v5083_v56  ;;  %v5164_v55 = vld [vmem:[#allocation6 + $0x78c] ss:$16 sps:$4 sm:$0xff]   ;;  %v5159_v56 = vld [vmem:[#allocation6 + $0x588] ss:$16 sps:$4 sm:$0xff]  }
 0x19f   :  { %2399 = vmatprep.subr.bf16.mxu1 %v5086_v57  ;;  %v5162_v57 = vld [vmem:[#allocation6 + $0x788] ss:$16 sps:$4 sm:$0xff]  }
 0x1a1   :  { %2359 = vmatpush2.bf16.msra.mxu0 %v5081_v59  ;;  %v5167_v59 = vld [vmem:[#allocation6 + $0x56c] ss:$16 sps:$4 sm:$0xff]  }
 0x1a2   :  { %2400 = vmatpush2.bf16.msra.mxu1 %v5084_v60  ;;  %2360 = vmatprep.subr.bf16.mxu0 %v5089_v61  ;;  %v5170_v60 = vld [vmem:[#allocation6 + $0x76c] ss:$16 sps:$4 sm:$0xff]   ;;  %v5165_v61 = vld [vmem:[#allocation6 + $0x568] ss:$16 sps:$4 sm:$0xff]  }
 0x1a3   :  { %2401 = vmatprep.subr.bf16.mxu1 %v5092_v62  ;;  %v5168_v62 = vld [vmem:[#allocation6 + $0x768] ss:$16 sps:$4 sm:$0xff]  }
 0x1a5   :  { %2361 = vmatpush2.bf16.msra.mxu0 %v5087_v1  ;;  %v5173_v1 = vld [vmem:[#allocation6 + $0x54c] ss:$16 sps:$4 sm:$0xff]  }
 0x1a6   :  { %2402 = vmatpush2.bf16.msra.mxu1 %v5090_v2  ;;  %2412 = vmatprep.subr.bf16.mxu0 %v5095_v6  ;;  %v5176_v2 = vld [vmem:[#allocation6 + $0x74c] ss:$16 sps:$4 sm:$0xff]   ;;  %v5771_v6 = vld [vmem:[%s5869_s2 + $0x8] sm:$0xf] }
 0x1a7   :  { %2453 = vmatprep.subr.bf16.mxu1 %v5098_v63  ;;  %v5171_v63 = vld [vmem:[#allocation6 + $0x548] ss:$16 sps:$4 sm:$0xff]  }
 0x1a8   :  { %2363 = vmatmul.mubr.bf16.vlgmr.msra.gmra.mxu0 %v5726_v3  ;;  %v5108_v3 = vld [vmem:[#allocation6 + $0x6a8] ss:$16 sps:$4 sm:$0xff]  }
 0x1a9   :  { %2404 = vmatmul.mubr.bf16.vlgmr.msra.gmra.mxu1 %v5718_v58  ;;  %2413 = vmatpush1.bf16.msra.mxu0 %v5093_v7  ;;  %v5116_v58 = vld [vmem:[#allocation6 + $0x68c] ss:$16 sps:$4 sm:$0xff]   ;;  %v5174_v7 = vld [vmem:[#allocation6 + $0x748] ss:$16 sps:$4 sm:$0xff]  }
 0x1aa   :  { %2444 = vmatprep.mubr.bf16.mxu0 %v5736_v22  ;;  %2454 = vmatpush1.bf16.msra.mxu1 %v5096_v0  ;;  %v5114_v22 = vld [vmem:[#allocation6 + $0x688] ss:$16 sps:$4 sm:$0xff]   ;;  %v5179_v0 = vld [vmem:[#allocation6 + $0x52c] ss:$16 sps:$4 sm:$0xff]  }
 0x1ab   :  { %2485 = vmatprep.mubr.bf16.mxu1 %v5738_v23  ;;  %2414 = vmatprep.subr.bf16.mxu0 %v5101_v8  ;;  %v5117_v23 = vld [vmem:[#allocation6 + $0x468] ss:$16 sps:$4 sm:$0xff]   ;;  %v5182_v8 = vld [vmem:[#allocation6 + $0x72c] ss:$16 sps:$4 sm:$0xff]  }
 0x1ac   :  { %2455 = vmatprep.subr.bf16.mxu1 %v5104_v9  ;;  %v193_v9 = vrot.slane %v5771_v6, %v5703_v34 }
 0x1ad   :  { %2415 = vmatpush1.bf16.msra.mxu0 %v5099_v10  ;;  %v201_v10 = vrot.slane %v5771_v6, %v5706_v35 }
 0x1ae   :  { %2456 = vmatpush1.bf16.msra.mxu1 %v5102_v11  ;;  %2416 = vmatprep.subr.bf16.mxu0 %v5107_v12  ;;  %v5177_v11 = vld [vmem:[#allocation6 + $0x528] ss:$16 sps:$4 sm:$0xff]  }
 0x1af   :  { %2457 = vmatprep.subr.bf16.mxu1 %v5110_v13  ;;  %v5180_v12 = vld [vmem:[#allocation6 + $0x728] ss:$16 sps:$4 sm:$0xff]   ;;  %v5185_v13 = vld [vmem:[#allocation6 + $0x50c] ss:$16 sps:$4 sm:$0xff]  }
 0x1b1   :  { %2417 = vmatpush1.bf16.msra.mxu0 %v5105_v14  ;;  %v5188_v14 = vld [vmem:[#allocation6 + $0x70c] ss:$16 sps:$4 sm:$0xff]  }
 0x1b2   :  { %2458 = vmatpush1.bf16.msra.mxu1 %v5108_v3  ;;  %2418 = vmatprep.subr.bf16.mxu0 %v5113_v15  ;;  %v539_v3 = vadd.f32 %v5746_v29, %v193_v9  ;;  %v580_v15 = vadd.f32 %v5748_v36, %v201_v10  ;;  %v5240_v9 = vld [vmem:[#allocation9 + $0x3e0] ss:$16 sps:$4 sm:$0xff]   ;;  %v5245_v10 = vld [vmem:[#allocation9 + $0x1c4] ss:$16 sps:$4 sm:$0xff]  }
 0x1b3   :  { %2459 = vmatprep.subr.bf16.mxu1 %v5116_v58  ;;  %v5183_v58 = vld [vmem:[#allocation6 + $0x508] ss:$16 sps:$4 sm:$0xff]  }
 0x1b5   :  { %2419 = vmatpush1.bf16.msra.mxu0 %v5111_v16  ;;  %v5186_v16 = vld [vmem:[#allocation6 + $0x708] ss:$16 sps:$4 sm:$0xff]  }
 0x1b6   :  { %2460 = vmatpush1.bf16.msra.mxu1 %v5114_v22  ;;  %2420 = vmatprep.subr.bf16.mxu0 %v5119_v17  ;;  %v5191_v22 = vld [vmem:[#allocation9 + $0xe4] ss:$16 sps:$4 sm:$0xff]  }
 0x1b7   :  { %2461 = vmatprep.subr.bf16.mxu1 %v5122_v18  ;;  %v5194_v17 = vld [vmem:[#allocation9 + $0x2e4] ss:$16 sps:$4 sm:$0xff]   ;;  %v593_v18 = vmax.f32 %v539_v3, 0.0 }
 0x1b8   :  { %v5254_v3 = vld [vmem:[#allocation9 + $0x3a4] ss:$16 sps:$4 sm:$0xff]  }
 0x1b9   :  { %2421 = vmatpush1.bf16.msra.mxu0 %v5117_v23  ;;  %v595_v23 = vmax.f32 %v580_v15, 0.0  ;;  %v5779_v29 = vpack.c.bf16 %v593_v18, %v593_v18  ;;  %v5249_v15 = vld [vmem:[#allocation9 + $0x1a0] ss:$16 sps:$4 sm:$0xff]  }
 0x1ba   :  { %2462 = vmatpush1.bf16.msra.mxu1 %v5120_v19  ;;  %2422 = vmatprep.subr.bf16.mxu0 %v5125_v20  ;;  %v5189_v19 = vld [vmem:[#allocation9 + $0xe0] ss:$16 sps:$4 sm:$0xff]  }
 0x1bb   :  { %2463 = vmatprep.subr.bf16.mxu1 %v5128_v21  ;;  %v5192_v20 = vld [vmem:[#allocation9 + $0x2e0] ss:$16 sps:$4 sm:$0xff]   ;;  %v5197_v21 = vld [vmem:[#allocation9 + $0xc4] ss:$16 sps:$4 sm:$0xff]  }
 0x1bc   :  { %v5258_v18 = vld [vmem:[#allocation9 + $0x380] ss:$16 sps:$4 sm:$0xff]  }
 0x1bd   :  { %2423 = vmatpush1.bf16.msra.mxu0 %v5123_v24 }
 0x1be   :  { %2464 = vmatpush1.bf16.msra.mxu1 %v5126_v25  ;;  %2424 = vmatprep.subr.bf16.mxu0 %v5131_v28  ;;  %v5200_v25 = vld [vmem:[#allocation9 + $0x2c4] ss:$16 sps:$4 sm:$0xff]   ;;  %v5786_v28 = vpack.c.bf16 %v595_v23, %v595_v23 }
 0x1bf   :  { %2465 = vmatprep.subr.bf16.mxu1 %v5134_v37  ;;  %v5195_v37 = vld [vmem:[#allocation9 + $0xc0] ss:$16 sps:$4 sm:$0xff]   ;;  %v5263_v23 = vld [vmem:[#allocation9 + $0x164] ss:$16 sps:$4 sm:$0xff]  }
 0x1c1   :  { %2425 = vmatpush1.bf16.msra.mxu0 %v5129_v38 }
 0x1c2   :  { %2466 = vmatpush1.bf16.msra.mxu1 %v5132_v39  ;;  %2426 = vmatprep.subr.bf16.mxu0 %v5137_v40  ;;  %v5198_v40 = vld [vmem:[#allocation9 + $0x2c0] ss:$16 sps:$4 sm:$0xff]  }
 0x1c3   :  { %2467 = vmatprep.subr.bf16.mxu1 %v5140_v41  ;;  %v5206_v41 = vld [vmem:[#allocation9 + $0x2a4] ss:$16 sps:$4 sm:$0xff]  }
 0x1c5   :  { %2427 = vmatpush1.bf16.msra.mxu0 %v5135_v42 }
 0x1c6   :  { %2468 = vmatpush1.bf16.msra.mxu1 %v5138_v43  ;;  %2428 = vmatprep.subr.bf16.mxu0 %v5143_v44 }
 0x1c7   :  { %2469 = vmatprep.subr.bf16.mxu1 %v5146_v30 }
 0x1c9   :  { %2429 = vmatpush2.bf16.msra.mxu0 %v5141_v45  ;;  %v5204_v45 = vld [vmem:[#allocation9 + $0x2a0] ss:$16 sps:$4 sm:$0xff]  }
 0x1ca   :  { %2470 = vmatpush2.bf16.msra.mxu1 %v5144_v46  ;;  %2430 = vmatprep.subr.bf16.mxu0 %v5149_v47  ;;  %v5209_v46 = vld [vmem:[#allocation9 + $0x84] ss:$16 sps:$4 sm:$0xff]  }
 0x1cb   :  { %2471 = vmatprep.subr.bf16.mxu1 %v5152_v48  ;;  %v5212_v47 = vld [vmem:[#allocation9 + $0x284] ss:$16 sps:$4 sm:$0xff]   ;;  %v5207_v48 = vld [vmem:[#allocation9 + $0x80] ss:$16 sps:$4 sm:$0xff]  }
 0x1cd   :  { %2431 = vmatpush2.bf16.msra.mxu0 %v5147_v49  ;;  %v5210_v49 = vld [vmem:[#allocation9 + $0x280] ss:$16 sps:$4 sm:$0xff]  }
 0x1ce   :  { %2472 = vmatpush2.bf16.msra.mxu1 %v5150_v31  ;;  %2432 = vmatprep.subr.bf16.mxu0 %v5155_v50  ;;  %v5215_v31 = vld [vmem:[#allocation9 + $0x64] ss:$16 sps:$4 sm:$0xff]  }
 0x1cf   :  { %2473 = vmatprep.subr.bf16.mxu1 %v5158_v5  ;;  %v5218_v50 = vld [vmem:[#allocation9 + $0x264] ss:$16 sps:$4 sm:$0xff]   ;;  %v5213_v5 = vld [vmem:[#allocation9 + $0x60] ss:$16 sps:$4 sm:$0xff]  }
 0x1d1   :  { %2433 = vmatpush2.bf16.msra.mxu0 %v5153_v51  ;;  %v5216_v51 = vld [vmem:[#allocation9 + $0x260] ss:$16 sps:$4 sm:$0xff]  }
 0x1d2   :  { %2474 = vmatpush2.bf16.msra.mxu1 %v5156_v53  ;;  %2434 = vmatprep.subr.bf16.mxu0 %v5161_v54  ;;  %v5221_v53 = vld [vmem:[#allocation9 + $0x44] ss:$16 sps:$4 sm:$0xff]  }
 0x1d3   :  { %2475 = vmatprep.subr.bf16.mxu1 %v5164_v55  ;;  %v5224_v54 = vld [vmem:[#allocation9 + $0x244] ss:$16 sps:$4 sm:$0xff]   ;;  %v5219_v55 = vld [vmem:[#allocation9 + $0x40] ss:$16 sps:$4 sm:$0xff]  }
 0x1d5   :  { %2435 = vmatpush2.bf16.msra.mxu0 %v5159_v56  ;;  %v5222_v56 = vld [vmem:[#allocation9 + $0x240] ss:$16 sps:$4 sm:$0xff]  }
 0x1d6   :  { %2476 = vmatpush2.bf16.msra.mxu1 %v5162_v57  ;;  %2436 = vmatprep.subr.bf16.mxu0 %v5167_v59  ;;  %v5227_v57 = vld [vmem:[#allocation9 + $0x24] ss:$16 sps:$4 sm:$0xff]  }
 0x1d7   :  { %2477 = vmatprep.subr.bf16.mxu1 %v5170_v60  ;;  %v5230_v59 = vld [vmem:[#allocation9 + $0x224] ss:$16 sps:$4 sm:$0xff]   ;;  %v5225_v60 = vld [vmem:[#allocation9 + $0x20] ss:$16 sps:$4 sm:$0xff]  }
 0x1d9   :  { %2437 = vmatpush2.bf16.msra.mxu0 %v5165_v61  ;;  %v5228_v61 = vld [vmem:[#allocation9 + $0x220] ss:$16 sps:$4 sm:$0xff]  }
 0x1da   :  { %2478 = vmatpush2.bf16.msra.mxu1 %v5168_v62  ;;  %2438 = vmatprep.subr.bf16.mxu0 %v5173_v1  ;;  %v5233_v62 = vld [vmem:[#allocation9 + $0x4] ss:$16 sps:$4 sm:$0xff]  }
 0x1db   :  { %2479 = vmatprep.subr.bf16.mxu1 %v5176_v2  ;;  %v5236_v1 = vld [vmem:[#allocation9 + $0x204] ss:$16 sps:$4 sm:$0xff]   ;;  %v5231_v2 = vld [vmem:[#allocation9] ss:$16 sps:$4 sm:$0xff]  }
 0x1dd   :  { %2439 = vmatpush2.bf16.msra.mxu0 %v5171_v63  ;;  %v5234_v63 = vld [vmem:[#allocation9 + $0x200] ss:$16 sps:$4 sm:$0xff]  }
 0x1de   :  { %2480 = vmatpush2.bf16.msra.mxu1 %v5174_v7  ;;  %2440 = vmatprep.subr.bf16.mxu0 %v5179_v0  ;;  %v5239_v7 = vld [vmem:[#allocation9 + $0x1e4] ss:$16 sps:$4 sm:$0xff]  }
 0x1df   :  { %2481 = vmatprep.subr.bf16.mxu1 %v5182_v8  ;;  %v5242_v0 = vld [vmem:[#allocation9 + $0x3e4] ss:$16 sps:$4 sm:$0xff]   ;;  %v5237_v8 = vld [vmem:[#allocation9 + $0x1e0] ss:$16 sps:$4 sm:$0xff]  }
 0x1e1   :  { %2441 = vmatpush2.bf16.msra.mxu0 %v5177_v11  ;;  %v5248_v11 = vld [vmem:[#allocation9 + $0x3c4] ss:$16 sps:$4 sm:$0xff]  }
 0x1e2   :  { %2482 = vmatpush2.bf16.msra.mxu1 %v5180_v12  ;;  %2442 = vmatprep.subr.bf16.mxu0 %v5185_v13  ;;  %v5243_v12 = vld [vmem:[#allocation9 + $0x1c0] ss:$16 sps:$4 sm:$0xff]  }
 0x1e3   :  { %2483 = vmatprep.subr.bf16.mxu1 %v5188_v14  ;;  %v5246_v13 = vld [vmem:[#allocation9 + $0x3c0] ss:$16 sps:$4 sm:$0xff]   ;;  %v5251_v14 = vld [vmem:[#allocation9 + $0x1a4] ss:$16 sps:$4 sm:$0xff]  }
 0x1e5   :  { %2443 = vmatpush2.bf16.msra.mxu0 %v5183_v58  ;;  %v5252_v58 = vld [vmem:[#allocation9 + $0x3a0] ss:$16 sps:$4 sm:$0xff]  }
 0x1e6   :  { %2484 = vmatpush2.bf16.msra.mxu1 %v5186_v16  ;;  %3292 = vmatprep.subr.bf16.mxu0 %v5191_v22  ;;  %v5257_v16 = vld [vmem:[#allocation9 + $0x184] ss:$16 sps:$4 sm:$0xff]  }
 0x1e7   :  { %3333 = vmatprep.subr.bf16.mxu1 %v5194_v17  ;;  %v5260_v22 = vld [vmem:[#allocation9 + $0x384] ss:$16 sps:$4 sm:$0xff]   ;;  %v5255_v17 = vld [vmem:[#allocation9 + $0x180] ss:$16 sps:$4 sm:$0xff]  }
 0x1e8   :  { %2445 = vmatmul.mubr.bf16.vlgmr.msra.gmra.mxu0 %v5758_v4  ;;  %v5782_v36 = vpop.f32.mrf.mxu0  ;;  %v5784_v24 = vpop.f32.mrf.mxu1  ;;  %v5203_v4 = vld [vmem:[#allocation9 + $0xa4] ss:$16 sps:$4 sm:$0xff]  }
 0x1e9   :  { %2486 = vmatmul.mubr.bf16.vlgmr.msra.gmra.mxu1 %v5756_v52  ;;  %3293 = vmatpush1.bf16.msra.mxu0 %v5189_v19  ;;  %v5201_v52 = vld [vmem:[#allocation9 + $0xa0] ss:$16 sps:$4 sm:$0xff]   ;;  %v5266_v19 = vld [vmem:[#allocation9 + $0x364] ss:$16 sps:$4 sm:$0xff]  }
 0x1ea   :  { %3324 = vmatprep.mubr.bf16.mxu0 %v5779_v29  ;;  %3334 = vmatpush1.bf16.msra.mxu1 %v5192_v20  ;;  %v5790_v38 = vpop.f32.mrf.mxu0  ;;  %v5792_v39 = vpop.f32.mrf.mxu1  ;;  %v5261_v20 = vld [vmem:[#allocation9 + $0x160] ss:$16 sps:$4 sm:$0xff]  }
 0x1eb   :  { %3365 = vmatprep.mubr.bf16.mxu1 %v5786_v28  ;;  %3294 = vmatprep.subr.bf16.mxu0 %v5197_v21  ;;  %v5264_v21 = vld [vmem:[#allocation9 + $0x360] ss:$16 sps:$4 sm:$0xff]  }
 0x1ec   :  { %3335 = vmatprep.subr.bf16.mxu1 %v5200_v25  ;;  %v2204_v42 = vpop.f32.mrf.mxu0  ;;  %v2245_v43 = vpop.f32.mrf.mxu1  ;;  %v5269_v25 = vld [vmem:[#allocation9 + $0x144] ss:$16 sps:$4 sm:$0xff]  }
 0x1ed   :  { %3295 = vmatpush1.bf16.msra.mxu0 %v5195_v37  ;;  %v5272_v37 = vld [vmem:[#allocation9 + $0x344] ss:$16 sps:$4 sm:$0xff]   ;;  %v197_v43 = vrot.slane %v5771_v6, %v5700_v33 }
 0x1ee   :  { %3336 = vmatpush1.bf16.msra.mxu1 %v5198_v40  ;;  %v2205_v44 = vpop.f32.mrf.mxu0  ;;  %v2246_v30 = vpop.f32.mrf.mxu1  ;;  %3296 = vmatprep.subr.bf16.mxu0 %v5203_v4  ;;  %v5267_v40 = vld [vmem:[#allocation9 + $0x140] ss:$16 sps:$4 sm:$0xff]   ;;  %v189_v4 = vrot.slane %v5771_v6, %v5697_v32  ;;  %v5275_v42 = vld [vmem:[#allocation9 + $0x124] ss:$16 sps:$4 sm:$0xff]  }
 0x1ef   :  { %3337 = vmatprep.subr.bf16.mxu1 %v5206_v41  ;;  %v5270_v41 = vld [vmem:[#allocation9 + $0x340] ss:$16 sps:$4 sm:$0xff]   ;;  %v5799_v44 = vld [vmem:[#allocation7] sm:$0xf] }
 0x1f0   :  { %v5273_v30 = vld [vmem:[#allocation9 + $0x120] ss:$16 sps:$4 sm:$0xff]   ;;  %v873_v6 = vrot.slane %v5799_v44, %v5703_v34 }
 0x1f1   :  { %3297 = vmatpush1.bf16.msra.mxu0 %v5201_v52  ;;  %v5278_v52 = vld [vmem:[#allocation9 + $0x324] ss:$16 sps:$4 sm:$0xff]  }
 0x1f2   :  { %3338 = vmatpush1.bf16.msra.mxu1 %v5204_v45  ;;  %3298 = vmatprep.subr.bf16.mxu0 %v5209_v46  ;;  %v537_v45 = vadd.f32 %v5740_v26, %v189_v4  ;;  %v5276_v46 = vld [vmem:[#allocation9 + $0x320] ss:$16 sps:$4 sm:$0xff]   ;;  %v5314_v4 = vld [vmem:[#allocation9 + $0x26c] ss:$16 sps:$4 sm:$0xff]  }
 0x1f3   :  { %3339 = vmatprep.subr.bf16.mxu1 %v5212_v47  ;;  %v5281_v47 = vld [vmem:[#allocation9 + $0x104] ss:$16 sps:$4 sm:$0xff]   ;;  %v5282_v26 = vld [vmem:[#allocation9 + $0x300] ss:$16 sps:$4 sm:$0xff]  }
 0x1f5   :  { %3299 = vmatpush1.bf16.msra.mxu0 %v5207_v48  ;;  %v578_v48 = vadd.f32 %v5742_v27, %v197_v43  ;;  %v5290_v27 = vld [vmem:[#allocation9 + $0x2ec] ss:$16 sps:$4 sm:$0xff]   ;;  %v5309_v43 = vld [vmem:[#allocation9 + $0x68] ss:$16 sps:$4 sm:$0xff]  }
 0x1f6   :  { %3340 = vmatpush1.bf16.msra.mxu1 %v5210_v49  ;;  %3300 = vmatprep.subr.bf16.mxu0 %v5215_v31  ;;  %v869_v49 = vrot.slane %v5799_v44, %v5697_v32  ;;  %v5284_v31 = vld [vmem:[#allocation9 + $0x304] ss:$16 sps:$4 sm:$0xff]  }
 0x1f7   :  { %3341 = vmatprep.subr.bf16.mxu1 %v5218_v50  ;;  %v5279_v50 = vld [vmem:[#allocation9 + $0x100] ss:$16 sps:$4 sm:$0xff]  }
 0x1f9   :  { %3301 = vmatpush1.bf16.msra.mxu0 %v5213_v5  ;;  %v592_v5 = vmax.f32 %v537_v45, 0.0 }
 0x1fa   :  { %3342 = vmatpush1.bf16.msra.mxu1 %v5216_v51  ;;  %3302 = vmatprep.subr.bf16.mxu0 %v5221_v53  ;;  %v5287_v51 = vld [vmem:[#allocation9 + $0xec] ss:$16 sps:$4 sm:$0xff]   ;;  %v594_v53 = vmax.f32 %v578_v48, 0.0 }
 0x1fb   :  { %3343 = vmatprep.subr.bf16.mxu1 %v5224_v54  ;;  %v2201_v54 = vadd.f32 %v5782_v36, %v869_v49  ;;  %v5296_v36 = vld [vmem:[#allocation9 + $0x2cc] ss:$16 sps:$4 sm:$0xff]  }
 0x1fd   :  { %3303 = vmatpush1.bf16.msra.mxu0 %v5219_v55  ;;  %v2203_v55 = vadd.f32 %v5790_v38, %v873_v6  ;;  %v5318_v6 = vld [vmem:[#allocation9 + $0x248] ss:$16 sps:$4 sm:$0xff]  }
 0x1fe   :  { %3344 = vmatpush1.bf16.msra.mxu1 %v5222_v56  ;;  %3304 = vmatprep.subr.bf16.mxu0 %v5227_v57  ;;  %v5285_v56 = vld [vmem:[#allocation9 + $0xe8] ss:$16 sps:$4 sm:$0xff]   ;;  %v5809_v57 = vpack.c.bf16 %v592_v5, %v592_v5 }
 0x1ff   :  { %3345 = vmatprep.subr.bf16.mxu1 %v5230_v59  ;;  %v5288_v59 = vld [vmem:[#allocation9 + $0x2e8] ss:$16 sps:$4 sm:$0xff]   ;;  %v2244_v38 = vadd.f32 %v5792_v39, %v2203_v55 }
 0x200   :  { %v5324_v55 = vld [vmem:[#allocation9 + $0x228] ss:$16 sps:$4 sm:$0xff]  }
 0x201   :  { %3305 = vmatpush1.bf16.msra.mxu0 %v5225_v60  ;;  %v5811_v60 = vpack.c.bf16 %v594_v53, %v594_v53 }
 0x202   :  { %3346 = vmatpush1.bf16.msra.mxu1 %v5228_v61  ;;  %3306 = vmatprep.subr.bf16.mxu0 %v5233_v62  ;;  %v2242_v61 = vadd.f32 %v5784_v24, %v2201_v54  ;;  %v5293_v62 = vld [vmem:[#allocation9 + $0xcc] ss:$16 sps:$4 sm:$0xff]   ;;  %v5294_v24 = vld [vmem:[#allocation9 + $0x2c8] ss:$16 sps:$4 sm:$0xff]  }
 0x203   :  { %3347 = vmatprep.subr.bf16.mxu1 %v5236_v1 }
 0x205   :  { %3307 = vmatpush1.bf16.msra.mxu0 %v5231_v2 }
 0x206   :  { %3348 = vmatpush1.bf16.msra.mxu1 %v5234_v63  ;;  %3308 = vmatprep.subr.bf16.mxu0 %v5239_v7  ;;  %v5291_v7 = vld [vmem:[#allocation9 + $0xc8] ss:$16 sps:$4 sm:$0xff]  }
 0x207   :  { %3349 = vmatprep.subr.bf16.mxu1 %v5242_v0 }
 0x209   :  { %3309 = vmatpush2.bf16.msra.mxu0 %v5237_v8 }
 0x20a   :  { %3350 = vmatpush2.bf16.msra.mxu1 %v5240_v9  ;;  %3310 = vmatprep.subr.bf16.mxu0 %v5245_v10  ;;  %v5299_v9 = vld [vmem:[#allocation9 + $0xac] ss:$16 sps:$4 sm:$0xff]  }
 0x20b   :  { %3351 = vmatprep.subr.bf16.mxu1 %v5248_v11 }
 0x20d   :  { %3311 = vmatpush2.bf16.msra.mxu0 %v5243_v12  ;;  %v5302_v12 = vld [vmem:[#allocation9 + $0x2ac] ss:$16 sps:$4 sm:$0xff]  }
 0x20e   :  { %3352 = vmatpush2.bf16.msra.mxu1 %v5246_v13  ;;  %3312 = vmatprep.subr.bf16.mxu0 %v5251_v14 }
 0x20f   :  { %3353 = vmatprep.subr.bf16.mxu1 %v5254_v3 }
 0x211   :  { %3313 = vmatpush2.bf16.msra.mxu0 %v5249_v15  ;;  %v5297_v15 = vld [vmem:[#allocation9 + $0xa8] ss:$16 sps:$4 sm:$0xff]  }
 0x212   :  { %3354 = vmatpush2.bf16.msra.mxu1 %v5252_v58  ;;  %3314 = vmatprep.subr.bf16.mxu0 %v5257_v16  ;;  %v5300_v16 = vld [vmem:[#allocation9 + $0x2a8] ss:$16 sps:$4 sm:$0xff]  }
 0x213   :  { %3355 = vmatprep.subr.bf16.mxu1 %v5260_v22  ;;  %v5305_v22 = vld [vmem:[#allocation9 + $0x8c] ss:$16 sps:$4 sm:$0xff]  }
 0x215   :  { %3315 = vmatpush2.bf16.msra.mxu0 %v5255_v17 }
 0x216   :  { %3356 = vmatpush2.bf16.msra.mxu1 %v5258_v18  ;;  %3316 = vmatprep.subr.bf16.mxu0 %v5263_v23 }
 0x217   :  { %3357 = vmatprep.subr.bf16.mxu1 %v5266_v19 }
 0x219   :  { %3317 = vmatpush2.bf16.msra.mxu0 %v5261_v20  ;;  %v5303_v20 = vld [vmem:[#allocation9 + $0x88] ss:$16 sps:$4 sm:$0xff]  }
 0x21a   :  { %3358 = vmatpush2.bf16.msra.mxu1 %v5264_v21  ;;  %3318 = vmatprep.subr.bf16.mxu0 %v5269_v25  ;;  %v5306_v21 = vld [vmem:[#allocation9 + $0x288] ss:$16 sps:$4 sm:$0xff]   ;;  %v5311_v25 = vld [vmem:[#allocation9 + $0x6c] ss:$16 sps:$4 sm:$0xff]  }
 0x21b   :  { %3359 = vmatprep.subr.bf16.mxu1 %v5272_v37 }
 0x21d   :  { %3319 = vmatpush2.bf16.msra.mxu0 %v5267_v40 }
 0x21e   :  { %3360 = vmatpush2.bf16.msra.mxu1 %v5270_v41  ;;  %3320 = vmatprep.subr.bf16.mxu0 %v5275_v42 }
 0x21f   :  { %3361 = vmatprep.subr.bf16.mxu1 %v5278_v52  ;;  %v5312_v52 = vld [vmem:[#allocation9 + $0x268] ss:$16 sps:$4 sm:$0xff]  }
 0x221   :  { %3321 = vmatpush2.bf16.msra.mxu0 %v5273_v30  ;;  %v5317_v30 = vld [vmem:[#allocation9 + $0x4c] ss:$16 sps:$4 sm:$0xff]  }
 0x222   :  { %3362 = vmatpush2.bf16.msra.mxu1 %v5276_v46  ;;  %3322 = vmatprep.subr.bf16.mxu0 %v5281_v47  ;;  %v5320_v47 = vld [vmem:[#allocation9 + $0x24c] ss:$16 sps:$4 sm:$0xff]  }
 0x223   :  { %3363 = vmatprep.subr.bf16.mxu1 %v5284_v31  ;;  %v5315_v31 = vld [vmem:[#allocation9 + $0x48] ss:$16 sps:$4 sm:$0xff]  }
 0x225   :  { %3323 = vmatpush2.bf16.msra.mxu0 %v5279_v50  ;;  %v5323_v50 = vld [vmem:[#allocation9 + $0x2c] ss:$16 sps:$4 sm:$0xff]  }
 0x226   :  { %3364 = vmatpush2.bf16.msra.mxu1 %v5282_v26  ;;  %3374 = vmatprep.subr.bf16.mxu0 %v5287_v51  ;;  %v5326_v51 = vld [vmem:[#allocation9 + $0x22c] ss:$16 sps:$4 sm:$0xff]  }
 0x227   :  { %3415 = vmatprep.subr.bf16.mxu1 %v5290_v27  ;;  %v5321_v27 = vld [vmem:[#allocation9 + $0x28] ss:$16 sps:$4 sm:$0xff]  }
 0x228   :  { %v2282_v1 = vpop.f32.mrf.mxu0  ;;  %v2323_v2 = vpop.f32.mrf.mxu1  ;;  %3325 = vmatmul.mubr.bf16.vlgmr.msra.gmra.mxu0 %v5809_v57 }
 0x229   :  { %v2283_v63 = vadd.f32 %v2282_v1, %v2242_v61  ;;  %3366 = vmatmul.mubr.bf16.vlgmr.msra.gmra.mxu1 %v5811_v60  ;;  %3375 = vmatpush1.bf16.msra.mxu0 %v5285_v56  ;;  %v5329_v56 = vld [vmem:[#allocation9 + $0xc] ss:$16 sps:$4 sm:$0xff]   ;;  %v5330_v1 = vld [vmem:[#allocation9 + $0x208] ss:$16 sps:$4 sm:$0xff]  }
 0x22a   :  { %3406 = vmatprep.mubr.bf16.mxu0 %v5779_v29  ;;  %3416 = vmatpush1.bf16.msra.mxu1 %v5288_v59  ;;  %v2284_v0 = vpop.f32.mrf.mxu0  ;;  %v2325_v8 = vpop.f32.mrf.mxu1  ;;  %v5332_v61 = vld [vmem:[#allocation9 + $0x20c] ss:$16 sps:$4 sm:$0xff]  }
 0x22b   :  { %v2324_v10 = vadd.f32 %v2323_v2, %v2283_v63  ;;  %3447 = vmatprep.mubr.bf16.mxu1 %v5786_v28  ;;  %v2285_v11 = vadd.f32 %v2284_v0, %v2244_v38  ;;  %3376 = vmatprep.subr.bf16.mxu0 %v5293_v62  ;;  %v5308_v28 = vld [vmem:[#allocation9 + $0x28c] ss:$16 sps:$4 sm:$0xff]   ;;  %v5327_v62 = vld [vmem:[#allocation9 + $0x8] ss:$16 sps:$4 sm:$0xff]  }
 0x22c   :  { %v2286_v13 = vpop.f32.mrf.mxu0  ;;  %v2327_v39 = vpop.f32.mrf.mxu1  ;;  %3417 = vmatprep.subr.bf16.mxu1 %v5296_v36  ;;  %v5335_v2 = vld [vmem:[#allocation9 + $0x1ec] ss:$16 sps:$4 sm:$0xff]   ;;  %v5333_v38 = vld [vmem:[#allocation9 + $0x1e8] ss:$16 sps:$4 sm:$0xff]  }
 0x22d   :  { %v2494_v14 = vmax.f32 %v2324_v10, 0.0  ;;  %v2326_v3 = vadd.f32 %v2325_v8, %v2285_v11  ;;  %3377 = vmatpush1.bf16.msra.mxu0 %v5291_v7  ;;  %v5338_v36 = vld [vmem:[#allocation9 + $0x3ec] ss:$16 sps:$4 sm:$0xff]   ;;  %v5336_v63 = vld [vmem:[#allocation9 + $0x3e8] ss:$16 sps:$4 sm:$0xff]  }
 0x22e   :  { %3418 = vmatpush1.bf16.msra.mxu1 %v5294_v24  ;;  %v2287_v29 = vpop.f32.mrf.mxu0  ;;  %v2328_v58 = vpop.f32.mrf.mxu1  ;;  %3378 = vmatprep.subr.bf16.mxu0 %v5299_v9  ;;  %v5341_v7 = vld [vmem:[#allocation9 + $0x1cc] ss:$16 sps:$4 sm:$0xff]   ;;  %v5339_v8 = vld [vmem:[#allocation9 + $0x1c8] ss:$16 sps:$4 sm:$0xff]  }
 0x22f   :  { %v5819_v17 = vpack.c.bf16 %v2494_v14, %v2494_v14  ;;  %v2495_v18 = vmax.f32 %v2326_v3, 0.0  ;;  %3419 = vmatprep.subr.bf16.mxu1 %v5302_v12  ;;  %v5344_v0 = vld [vmem:[#allocation9 + $0x3cc] ss:$16 sps:$4 sm:$0xff]   ;;  %v5342_v24 = vld [vmem:[#allocation9 + $0x3c8] ss:$16 sps:$4 sm:$0xff]  }
 0x230   :  { %v5347_v9 = vld [vmem:[#allocation9 + $0x1ac] ss:$16 sps:$4 sm:$0xff]   ;;  %v5345_v11 = vld [vmem:[#allocation9 + $0x1a8] ss:$16 sps:$4 sm:$0xff]  }
 0x231   :  { %v4144_v23 = vunpack.c.l.bf16 %v5819_v17  ;;  %v5822_v19 = vpack.c.bf16 %v2495_v18, %v2495_v18  ;;  %3379 = vmatpush1.bf16.msra.mxu0 %v5297_v15  ;;  %v5350_v10 = vld [vmem:[#allocation9 + $0x3ac] ss:$16 sps:$4 sm:$0xff]   ;;  %v5348_v12 = vld [vmem:[#allocation9 + $0x3a8] ss:$16 sps:$4 sm:$0xff]  }
 0x232   :  { %3420 = vmatpush1.bf16.msra.mxu1 %v5300_v16  ;;  %3380 = vmatprep.subr.bf16.mxu0 %v5305_v22  ;;  %v5353_v13 = vld [vmem:[#allocation9 + $0x18c] ss:$16 sps:$4 sm:$0xff]   ;;  %v5351_v14 = vld [vmem:[#allocation9 + $0x188] ss:$16 sps:$4 sm:$0xff]  }
 0x233   :  { %v4148_v37 = vrot.slane %v4144_v23, 4  ;;  %v4145_v40 = vunpack.c.l.bf16 %v5822_v19  ;;  %3421 = vmatprep.subr.bf16.mxu1 %v5308_v28  ;;  %v5356_v39 = vld [vmem:[#allocation9 + $0x38c] ss:$16 sps:$4 sm:$0xff]   ;;  %v5354_v3 = vld [vmem:[#allocation9 + $0x388] ss:$16 sps:$4 sm:$0xff]  }
 0x234   :  { %v5359_v15 = vld [vmem:[#allocation9 + $0x16c] ss:$16 sps:$4 sm:$0xff]   ;;  %v5357_v58 = vld [vmem:[#allocation9 + $0x168] ss:$16 sps:$4 sm:$0xff]  }
 0x235   :  { %v4149_v41 = vadd.f32 %v4148_v37, %v4144_v23  ;;  %v4154_v42 = vrot.slane %v4145_v40, 4  ;;  %3381 = vmatpush1.bf16.msra.mxu0 %v5303_v20  ;;  %v5362_v29 = vld [vmem:[#allocation9 + $0x36c] ss:$16 sps:$4 sm:$0xff]   ;;  %v5360_v16 = vld [vmem:[#allocation9 + $0x368] ss:$16 sps:$4 sm:$0xff]  }
 0x236   :  { %3422 = vmatpush1.bf16.msra.mxu1 %v5306_v21  ;;  %3382 = vmatprep.subr.bf16.mxu0 %v5311_v25  ;;  %v5365_v22 = vld [vmem:[#allocation9 + $0x14c] ss:$16 sps:$4 sm:$0xff]   ;;  %v5363_v28 = vld [vmem:[#allocation9 + $0x148] ss:$16 sps:$4 sm:$0xff]  }
 0x237   :  { %v4150_v45 = vrot.slane %v4149_v41, 2  ;;  %v4155_v46 = vadd.f32 %v4154_v42, %v4145_v40  ;;  %3423 = vmatprep.subr.bf16.mxu1 %v5314_v4  ;;  %v5368_v18 = vld [vmem:[#allocation9 + $0x34c] ss:$16 sps:$4 sm:$0xff]   ;;  %v5366_v23 = vld [vmem:[#allocation9 + $0x348] ss:$16 sps:$4 sm:$0xff]  }
 0x238   :  { %v5371_v20 = vld [vmem:[#allocation9 + $0x12c] ss:$16 sps:$4 sm:$0xff]   ;;  %v5369_v25 = vld [vmem:[#allocation9 + $0x128] ss:$16 sps:$4 sm:$0xff]  }
 0x239   :  { %v4151_v48 = vadd.f32 %v4150_v45, %v4149_v41  ;;  %v4156_v49 = vrot.slane %v4155_v46, 2  ;;  %3383 = vmatpush1.bf16.msra.mxu0 %v5309_v43  ;;  %v5374_v21 = vld [vmem:[#allocation9 + $0x32c] ss:$16 sps:$4 sm:$0xff]   ;;  %v5372_v37 = vld [vmem:[#allocation9 + $0x328] ss:$16 sps:$4 sm:$0xff]  }
 0x23a   :  { %3424 = vmatpush1.bf16.msra.mxu1 %v5312_v52  ;;  %3384 = vmatprep.subr.bf16.mxu0 %v5317_v30  ;;  %v5377_v40 = vld [vmem:[#allocation9 + $0x10c] ss:$16 sps:$4 sm:$0xff]   ;;  %v5375_v41 = vld [vmem:[#allocation9 + $0x108] ss:$16 sps:$4 sm:$0xff]  }
 0x23b   :  { %v4152_v5 = vrot.slane %v4151_v48, 1  ;;  %v4157_v26 = vadd.f32 %v4156_v49, %v4155_v46  ;;  %3425 = vmatprep.subr.bf16.mxu1 %v5320_v47  ;;  %v5380_v4 = vld [vmem:[#allocation9 + $0x30c] ss:$16 sps:$4 sm:$0xff]   ;;  %v5378_v42 = vld [vmem:[#allocation9 + $0x308] ss:$16 sps:$4 sm:$0xff]  }
 0x23c   :  { %v5381_v43 = vld [vmem:[#allocation12 + $0x78] sm:$0xff]   ;;  %v5383_v45 = vld [vmem:[#allocation12 + $0x70] sm:$0xff]  }
 0x23d   :  { %v4153_v53 = vadd.f32 %v4152_v5, %v4151_v48  ;;  %v4158_v54 = vrot.slane %v4157_v26, 1  ;;  %3385 = vmatpush1.bf16.msra.mxu0 %v5315_v31  ;;  %v5397_v52 = vld [vmem:[#allocation12 + $0xf8] sm:$0xff]   ;;  %v5399_v48 = vld [vmem:[#allocation12 + $0xf0] sm:$0xff]  }
 0x23e   :  { %3426 = vmatpush1.bf16.msra.mxu1 %v5318_v6  ;;  %3386 = vmatprep.subr.bf16.mxu0 %v5323_v50  ;;  %v5382_v30 = vld [vmem:[#allocation12 + $0x38] sm:$0xff]   ;;  %v5384_v31 = vld [vmem:[#allocation12 + $0x30] sm:$0xff]   ;;  %v5385_v50 = vld [vmem:[#allocation12 + $0x68] sm:$0xff]  }
 0x23f   :  { %4172 = vst [vmem:[%s5877_s10] sm:$0xff] %v4153_v53  ;;  %v4159_v59 = vadd.f32 %v4158_v54, %v4157_v26  ;;  %3427 = vmatprep.subr.bf16.mxu1 %v5326_v51  ;;  %v5398_v46 = vld [vmem:[#allocation12 + $0xb8] sm:$0xff]   ;;  %v5400_v26 = vld [vmem:[#allocation12 + $0xb0] sm:$0xff]   ;;  %v5386_v54 = vld [vmem:[#allocation12 + $0x28] sm:$0xff]  }
 0x241   :  { %4173 = vst [vmem:[%s5877_s10 + $0x8] sm:$0xff] %v4159_v59  ;;  %3387 = vmatpush1.bf16.msra.mxu0 %v5321_v27  ;;  %v5388_v59 = vld [vmem:[#allocation12 + $0x20] sm:$0xff]  }
 0x242   :  { %3428 = vmatpush1.bf16.msra.mxu1 %v5324_v55  ;;  %3388 = vmatprep.subr.bf16.mxu0 %v5329_v56  ;;  %v5403_v56 = vld [vmem:[#allocation12 + $0xe0] sm:$0xff]  }
 0x243   :  { %3429 = vmatprep.subr.bf16.mxu1 %v5332_v61  ;;  %v5389_v61 = vld [vmem:[#allocation12 + $0x58] sm:$0xff]  }
 0x245   :  { %3389 = vmatpush1.bf16.msra.mxu0 %v5327_v62  ;;  %v5404_v62 = vld [vmem:[#allocation12 + $0xa0] sm:$0xff]  }
 0x246   :  { %3430 = vmatpush1.bf16.msra.mxu1 %v5330_v1  ;;  %3390 = vmatprep.subr.bf16.mxu0 %v5335_v2  ;;  %v5405_v1 = vld [vmem:[#allocation12 + $0xd8] sm:$0xff]  }
 0x247   :  { %3431 = vmatprep.subr.bf16.mxu1 %v5338_v36  ;;  %v5390_v2 = vld [vmem:[#allocation12 + $0x18] sm:$0xff]   ;;  %v5391_v36 = vld [vmem:[#allocation12 + $0x50] sm:$0xff]  }
 0x249   :  { %3391 = vmatpush2.bf16.msra.mxu0 %v5333_v38  ;;  %v5406_v38 = vld [vmem:[#allocation12 + $0x98] sm:$0xff]  }
 0x24a   :  { %3432 = vmatpush2.bf16.msra.mxu1 %v5336_v63  ;;  %3392 = vmatprep.subr.bf16.mxu0 %v5341_v7  ;;  %v5407_v63 = vld [vmem:[#allocation12 + $0xd0] sm:$0xff]  }
 0x24b   :  { %3433 = vmatprep.subr.bf16.mxu1 %v5344_v0  ;;  %v5392_v7 = vld [vmem:[#allocation12 + $0x10] sm:$0xff]   ;;  %v5393_v0 = vld [vmem:[#allocation12 + $0x48] sm:$0xff]  }
 0x24d   :  { %3393 = vmatpush2.bf16.msra.mxu0 %v5339_v8  ;;  %v5408_v8 = vld [vmem:[#allocation12 + $0x90] sm:$0xff]  }
 0x24e   :  { %3434 = vmatpush2.bf16.msra.mxu1 %v5342_v24  ;;  %3394 = vmatprep.subr.bf16.mxu0 %v5347_v9  ;;  %v5409_v24 = vld [vmem:[#allocation12 + $0xc8] sm:$0xff]  }
 0x24f   :  { %3435 = vmatprep.subr.bf16.mxu1 %v5350_v10  ;;  %v5394_v9 = vld [vmem:[#allocation12 + $0x8] sm:$0xff]   ;;  %v5395_v10 = vld [vmem:[#allocation12 + $0x40] sm:$0xff]  }
 0x251   :  { %3395 = vmatpush2.bf16.msra.mxu0 %v5345_v11  ;;  %v5410_v11 = vld [vmem:[#allocation12 + $0x88] sm:$0xff]  }
 0x252   :  { %3436 = vmatpush2.bf16.msra.mxu1 %v5348_v12  ;;  %3396 = vmatprep.subr.bf16.mxu0 %v5353_v13  ;;  %v5411_v12 = vld [vmem:[#allocation12 + $0xc0] sm:$0xff]  }
 0x253   :  { %3437 = vmatprep.subr.bf16.mxu1 %v5356_v39  ;;  %v5396_v13 = vld [vmem:[#allocation12] sm:$0xff]   ;;  %v5413_v39 = vld [vmem:[#allocation12 + $0x178] sm:$0xff]  }
 0x255   :  { %3397 = vmatpush2.bf16.msra.mxu0 %v5351_v14  ;;  %v5412_v14 = vld [vmem:[#allocation12 + $0x80] sm:$0xff]  }
 0x256   :  { %3438 = vmatpush2.bf16.msra.mxu1 %v5354_v3  ;;  %3398 = vmatprep.subr.bf16.mxu0 %v5359_v15  ;;  %v5429_v3 = vld [vmem:[#allocation12 + $0x1f8] sm:$0xff]  }
 0x257   :  { %3439 = vmatprep.subr.bf16.mxu1 %v5362_v29  ;;  %v5414_v15 = vld [vmem:[#allocation12 + $0x138] sm:$0xff]   ;;  %v5415_v29 = vld [vmem:[#allocation12 + $0x170] sm:$0xff]  }
 0x259   :  { %3399 = vmatpush2.bf16.msra.mxu0 %v5357_v58  ;;  %v5416_v58 = vld [vmem:[#allocation12 + $0x130] sm:$0xff]  }
 0x25a   :  { %3440 = vmatpush2.bf16.msra.mxu1 %v5360_v16  ;;  %3400 = vmatprep.subr.bf16.mxu0 %v5365_v22  ;;  %v5417_v16 = vld [vmem:[#allocation12 + $0x168] sm:$0xff]  }
 0x25b   :  { %3441 = vmatprep.subr.bf16.mxu1 %v5368_v18  ;;  %v5418_v22 = vld [vmem:[#allocation12 + $0x128] sm:$0xff]   ;;  %v5419_v18 = vld [vmem:[#allocation12 + $0x160] sm:$0xff]  }
 0x25d   :  { %3401 = vmatpush2.bf16.msra.mxu0 %v5363_v28  ;;  %v5420_v28 = vld [vmem:[#allocation12 + $0x120] sm:$0xff]  }
 0x25e   :  { %3442 = vmatpush2.bf16.msra.mxu1 %v5366_v23  ;;  %3402 = vmatprep.subr.bf16.mxu0 %v5371_v20  ;;  %v5421_v23 = vld [vmem:[#allocation12 + $0x158] sm:$0xff]  }
 0x25f   :  { %3443 = vmatprep.subr.bf16.mxu1 %v5374_v21  ;;  %v5422_v20 = vld [vmem:[#allocation12 + $0x118] sm:$0xff]   ;;  %v5423_v21 = vld [vmem:[#allocation12 + $0x150] sm:$0xff]  }
 0x261   :  { %3403 = vmatpush2.bf16.msra.mxu0 %v5369_v25  ;;  %v5424_v25 = vld [vmem:[#allocation12 + $0x110] sm:$0xff]  }
 0x262   :  { %3444 = vmatpush2.bf16.msra.mxu1 %v5372_v37  ;;  %3404 = vmatprep.subr.bf16.mxu0 %v5377_v40  ;;  %v5426_v37 = vld [vmem:[#allocation12 + $0x108] sm:$0xff]   ;;  %v5427_v40 = vld [vmem:[#allocation12 + $0x140] sm:$0xff]  }
 0x263   :  { %3445 = vmatprep.subr.bf16.mxu1 %v5380_v4  ;;  %v877_v4 = vrot.slane %v5799_v44, %v5700_v33 }
 0x265   :  { %3405 = vmatpush2.bf16.msra.mxu0 %v5375_v41  ;;  %v881_v41 = vrot.slane %v5799_v44, %v5706_v35 }
 0x266   :  { %3446 = vmatpush2.bf16.msra.mxu1 %v5378_v42  ;;  %4667 = vmatprep.subr.bf16.mxu0 %v5381_v43  ;;  %v5428_v42 = vld [vmem:[#allocation12 + $0x100] sm:$0xff]  }
 0x267   :  { %4689 = vmatprep.subr.bf16.mxu1 %v5397_v52 }
 0x268   :  { %v5831_v47 = vpop.f32.mrf.mxu0  ;;  %3407 = vmatmul.mubr.bf16.vlgmr.msra.gmra.mxu0 %v5809_v57  ;;  %v5401_v57 = vld [vmem:[#allocation12 + $0xe8] sm:$0xff]  }
 0x269   :  { %v5834_v49 = vpop.f32.mrf.mxu1  ;;  %3448 = vmatmul.mubr.bf16.vlgmr.msra.gmra.mxu1 %v5811_v60  ;;  %4668 = vmatpush3.bf16.msra.mxu0 %v5382_v30  ;;  %v5387_v60 = vld [vmem:[#allocation12 + $0x60] sm:$0xff]   ;;  %v2365_v43 = vadd.f32 %v5831_v47, %v877_v4 }
 0x26a   :  { %4015 = vmatprep.mubr.bf16.mxu0 %v5822_v19  ;;  %v5838_v6 = vpop.f32.mrf.mxu0  ;;  %4669 = vmatprep.subr.bf16.mxu0 %v5383_v45  ;;  %v5402_v19 = vld [vmem:[#allocation12 + $0xa8] sm:$0xff]  }
 0x26b   :  { %v5840_v5 = vpop.f32.mrf.mxu1  ;;  %4690 = vmatpush3.bf16.msra.mxu1 %v5398_v46  ;;  %v2367_v52 = vadd.f32 %v5838_v6, %v881_v41  ;;  %v2406_v30 = vadd.f32 %v5834_v49, %v2365_v43  ;;  %v5430_v49 = vld [vmem:[#allocation12 + $0x1b8] sm:$0xff]  }
 0x26c   :  { %v2368_v51 = vpop.f32.mrf.mxu0  ;;  %4691 = vmatprep.subr.bf16.mxu1 %v5399_v48 }
 0x26d   :  { %v2409_v53 = vpop.f32.mrf.mxu1  ;;  %4670 = vmatpush3.bf16.msra.mxu0 %v5384_v31  ;;  %v2408_v46 = vadd.f32 %v5840_v5, %v2367_v52 }
 0x26e   :  { %v2369_v27 = vpop.f32.mrf.mxu0  ;;  %4671 = vmatprep.subr.bf16.mxu0 %v5385_v50 }
 0x26f   :  { %v2410_v55 = vpop.f32.mrf.mxu1  ;;  %4692 = vmatpush3.bf16.msra.mxu1 %v5400_v26 }
 0x270   :  { %4693 = vmatprep.subr.bf16.mxu1 %v5401_v57 }
 0x271   :  { %4672 = vmatpush3.bf16.msra.mxu0 %v5386_v54 }
 0x272   :  { %4673 = vmatprep.subr.bf16.mxu0 %v5387_v60 }
 0x273   :  { %4694 = vmatpush3.bf16.msra.mxu1 %v5402_v19 }
 0x274   :  { %4695 = vmatprep.subr.bf16.mxu1 %v5403_v56 }
 0x275   :  { %4674 = vmatpush3.bf16.msra.mxu0 %v5388_v59  ;;  %v5431_v59 = vld [vmem:[#allocation12 + $0x1f0] sm:$0xff]  }
 0x276   :  { %4675 = vmatprep.subr.bf16.mxu0 %v5389_v61 }
 0x277   :  { %4696 = vmatpush3.bf16.msra.mxu1 %v5404_v62 }
 0x278   :  { %4697 = vmatprep.subr.bf16.mxu1 %v5405_v1 }
 0x279   :  { %4676 = vmatpush3.bf16.msra.mxu0 %v5390_v2  ;;  %v5432_v2 = vld [vmem:[#allocation12 + $0x1b0] sm:$0xff]  }
 0x27a   :  { %4677 = vmatprep.subr.bf16.mxu0 %v5391_v36  ;;  %v5433_v36 = vld [vmem:[#allocation12 + $0x1e8] sm:$0xff]  }
 0x27b   :  { %4698 = vmatpush3.bf16.msra.mxu1 %v5406_v38 }
 0x27c   :  { %4699 = vmatprep.subr.bf16.mxu1 %v5407_v63 }
 0x27d   :  { %4678 = vmatpush3.bf16.msra.mxu0 %v5392_v7 }
 0x27e   :  { %4679 = vmatprep.subr.bf16.mxu0 %v5393_v0 }
 0x27f   :  { %4700 = vmatpush3.bf16.msra.mxu1 %v5408_v8  ;;  %v5434_v8 = vld [vmem:[#allocation12 + $0x1a8] sm:$0xff]  }
 0x280   :  { %4701 = vmatprep.subr.bf16.mxu1 %v5409_v24  ;;  %v5435_v24 = vld [vmem:[#allocation12 + $0x1e0] sm:$0xff]  }
 0x281   :  { %4680 = vmatpush3.bf16.msra.mxu0 %v5394_v9 }
 0x282   :  { %4681 = vmatprep.subr.bf16.mxu0 %v5395_v10 }
 0x283   :  { %4702 = vmatpush3.bf16.msra.mxu1 %v5410_v11 }
 0x284   :  { %4703 = vmatprep.subr.bf16.mxu1 %v5411_v12 }
 0x285   :  { %4682 = vmatpush3.bf16.msra.mxu0 %v5396_v13  ;;  %v5436_v13 = vld [vmem:[#allocation12 + $0x1a0] sm:$0xff]  }
 0x286   :  { %4711 = vmatprep.subr.bf16.mxu0 %v5413_v39  ;;  %v5437_v39 = vld [vmem:[#allocation12 + $0x1d8] sm:$0xff]  }
 0x287   :  { %4704 = vmatpush3.bf16.msra.mxu1 %v5412_v14 }
 0x288   :  { %4016 = vmatmul.mubr.bf16.vlgmr.msra.gmra.mxu0 %v5819_v17  ;;  %4733 = vmatprep.subr.bf16.mxu1 %v5429_v3  ;;  %v5425_v17 = vld [vmem:[#allocation12 + $0x148] sm:$0xff]   ;;  %v5438_v3 = vld [vmem:[#allocation12 + $0x198] sm:$0xff]  }
 0x289   :  { %4712 = vmatpush3.bf16.msra.mxu0 %v5414_v15  ;;  %v5439_v15 = vld [vmem:[#allocation12 + $0x1d0] sm:$0xff]  }
 0x28a   :  { %4713 = vmatprep.subr.bf16.mxu0 %v5415_v29  ;;  %v5440_v29 = vld [vmem:[#allocation12 + $0x190] sm:$0xff]  }
 0x28d   :  { %4714 = vmatpush3.bf16.msra.mxu0 %v5416_v58  ;;  %v5441_v58 = vld [vmem:[#allocation12 + $0x1c8] sm:$0xff]  }
 0x28e   :  { %4715 = vmatprep.subr.bf16.mxu0 %v5417_v16  ;;  %v5442_v16 = vld [vmem:[#allocation12 + $0x188] sm:$0xff]  }
 0x291   :  { %4716 = vmatpush3.bf16.msra.mxu0 %v5418_v22  ;;  %v5443_v22 = vld [vmem:[#allocation12 + $0x1c0] sm:$0xff]  }
 0x292   :  { %4717 = vmatprep.subr.bf16.mxu0 %v5419_v18  ;;  %v5444_v18 = vld [vmem:[#allocation12 + $0x180] sm:$0xff]  }
 0x295   :  { %4718 = vmatpush3.bf16.msra.mxu0 %v5420_v28  ;;  %v2630_v28 = vld [vmem:[#allocation10] sm:$0xf] }
 0x296   :  { %4719 = vmatprep.subr.bf16.mxu0 %v5421_v23  ;;  %v2635_v23 = vrot.slane %v2630_v28, %v5697_v32  ;;  %v2643_v32 = vrot.slane %v2630_v28, %v5700_v33 }
 0x299   :  { %4720 = vmatpush3.bf16.msra.mxu0 %v5422_v20  ;;  %v2639_v20 = vrot.slane %v2630_v28, %v5703_v34  ;;  %v2647_v34 = vrot.slane %v2630_v28, %v5706_v35 }
 0x29a   :  { %4721 = vmatprep.subr.bf16.mxu0 %v5423_v21 }
 0x29d   :  { %4722 = vmatpush3.bf16.msra.mxu0 %v5424_v25 }
 0x29e   :  { %4723 = vmatprep.subr.bf16.mxu0 %v5425_v17 }
 0x2a1   :  { %4724 = vmatpush3.bf16.msra.mxu0 %v5426_v37 }
 0x2a2   :  { %4725 = vmatprep.subr.bf16.mxu0 %v5427_v40 }
 0x2a5   :  { %4726 = vmatpush3.bf16.msra.mxu0 %v5428_v42 }
 0x2a8   :  { %v2446_v45 = vpop.f32.mrf.mxu0 }
 0x2a9   :  { %v2447_v48 = vadd.f32 %v2446_v45, %v2406_v30  ;;  %v2487_v31 = vpop.f32.mrf.mxu1 }
 0x2aa   :  { %v2448_v50 = vpop.f32.mrf.mxu0 }
 0x2ab   :  { %v2488_v26 = vadd.f32 %v2487_v31, %v2447_v48  ;;  %v2449_v51 = vadd.f32 %v2448_v50, %v2408_v46  ;;  %v2489_v57 = vpop.f32.mrf.mxu1 }
 0x2ac   :  { %v2450_v44 = vpop.f32.mrf.mxu0 }
 0x2ad   :  { %v2496_v53 = vmax.f32 %v2488_v26, 0.0  ;;  %v2490_v54 = vadd.f32 %v2489_v57, %v2449_v51  ;;  %v2491_v27 = vpop.f32.mrf.mxu1 }
 0x2ae   :  { %v2451_v60 = vpop.f32.mrf.mxu0 }
 0x2af   :  { %v2500_v47 = vpack.c.bf16 %v2496_v53, %v2496_v53  ;;  %v2497_v55 = vmax.f32 %v2490_v54, 0.0  ;;  %v2492_v6 = vpop.f32.mrf.mxu1 }
 0x2b1   :  { %v4146_v19 = vunpack.c.l.bf16 %v2500_v47  ;;  %v2501_v56 = vpack.c.bf16 %v2497_v55, %v2497_v55 }
 0x2b3   :  { %v4160_v61 = vrot.slane %v4146_v19, 4  ;;  %v4147_v5 = vunpack.c.l.bf16 %v2501_v56  ;;  %4055 = vmatprep.mubr.bf16.mxu1 %v2501_v56 }
 0x2b4   :  { %4056 = vmatmul.mubr.bf16.vlgmr.msra.gmra.mxu1 %v2500_v47 }
 0x2b5   :  { %v4161_v62 = vadd.f32 %v4160_v61, %v4146_v19  ;;  %v4166_v1 = vrot.slane %v4147_v5, 4  ;;  %4734 = vmatpush3.bf16.msra.mxu1 %v5430_v49 }
 0x2b6   :  { %4735 = vmatprep.subr.bf16.mxu1 %v5431_v59 }
 0x2b7   :  { %v4162_v38 = vrot.slane %v4161_v62, 2  ;;  %v4167_v63 = vadd.f32 %v4166_v1, %v4147_v5 }
 0x2b9   :  { %v4163_v7 = vadd.f32 %v4162_v38, %v4161_v62  ;;  %v4168_v0 = vrot.slane %v4167_v63, 2  ;;  %4736 = vmatpush3.bf16.msra.mxu1 %v5432_v2  ;;  %v4602_v2 = vld [vmem:[%s5875_s8] ss:$0 sm:$0xff] }
 0x2ba   :  { %4737 = vmatprep.subr.bf16.mxu1 %v5433_v36 }
 0x2bb   :  { %v4164_v9 = vrot.slane %v4163_v7, 1  ;;  %v4169_v10 = vadd.f32 %v4168_v0, %v4167_v63 }
 0x2bd   :  { %v4165_v11 = vadd.f32 %v4164_v9, %v4163_v7  ;;  %v4170_v12 = vrot.slane %v4169_v10, 1  ;;  %4738 = vmatpush3.bf16.msra.mxu1 %v5434_v8 }
 0x2be   :  { %4739 = vmatprep.subr.bf16.mxu1 %v5435_v24 }
 0x2bf   :  { %4174 = vst [vmem:[%s5877_s10 + $0x10] sm:$0xff] %v4165_v11  ;;  %v4171_v14 = vadd.f32 %v4170_v12, %v4169_v10 }
 0x2c1   :  { %4175 = vst [vmem:[%s5877_s10 + $0x18] sm:$0xff] %v4171_v14  ;;  %4740 = vmatpush3.bf16.msra.mxu1 %v5436_v13 }
 0x2c2   :  { %4741 = vmatprep.subr.bf16.mxu1 %v5437_v39 }
 0x2c5   :  { %4742 = vmatpush3.bf16.msra.mxu1 %v5438_v3 }
 0x2c6   :  { %4743 = vmatprep.subr.bf16.mxu1 %v5439_v15 }
 0x2c9   :  { %4744 = vmatpush3.bf16.msra.mxu1 %v5440_v29 }
 0x2ca   :  { %4745 = vmatprep.subr.bf16.mxu1 %v5441_v58 }
 0x2cd   :  { %4746 = vmatpush3.bf16.msra.mxu1 %v5442_v16 }
 0x2ce   :  { %4747 = vmatprep.subr.bf16.mxu1 %v5443_v22 }
 0x2d1   :  { %4748 = vmatpush3.bf16.msra.mxu1 %v5444_v18 }
 0x2e8   :  { %v3326_v21 = vpop.f32.mrf.mxu0 }
 0x2e9   :  { %v3327_v25 = vadd.f32 %v3326_v21, %v2635_v23  ;;  %v3367_v17 = vpop.f32.mrf.mxu1 }
 0x2ea   :  { %v3328_v37 = vpop.f32.mrf.mxu0 }
 0x2eb   :  { %v3368_v40 = vadd.f32 %v3367_v17, %v3327_v25  ;;  %v3329_v4 = vadd.f32 %v3328_v37, %v2639_v20  ;;  %v3369_v41 = vpop.f32.mrf.mxu1 }
 0x2ec   :  { %v3330_v42 = vpop.f32.mrf.mxu0 }
 0x2ed   :  { %v3370_v43 = vadd.f32 %v3369_v41, %v3329_v4  ;;  %v3371_v52 = vpop.f32.mrf.mxu1  ;;  %v3456_v30 = vmax.f32 %v3368_v40, 0.0 }
 0x2ee   :  { %v3331_v45 = vpop.f32.mrf.mxu0 }
 0x2ef   :  { %v3457_v46 = vmax.f32 %v3370_v43, 0.0  ;;  %v3372_v48 = vpop.f32.mrf.mxu1  ;;  %v3460_v50 = vpack.c.bf16 %v3456_v30, %v3456_v30 }
 0x2f1   :  { %v3461_v31 = vpack.c.bf16 %v3457_v46, %v3457_v46 }
 0x2f3   :  { %4095 = vmatprep.mubr.bf16.mxu0 %v3461_v31 }
 0x2f4   :  { %4096 = vmatmul.mubr.bf16.vlgmr.msra.gmra.mxu0 %v3460_v50 }
 0x328   :  { %v3408_v26 = vpop.f32.mrf.mxu0 }
 0x329   :  { %v3409_v51 = vadd.f32 %v3408_v26, %v2643_v32  ;;  %v3449_v57 = vpop.f32.mrf.mxu1 }
 0x32a   :  { %v3410_v44 = vpop.f32.mrf.mxu0 }
 0x32b   :  { %v3450_v53 = vadd.f32 %v3449_v57, %v3409_v51  ;;  %v3411_v54 = vadd.f32 %v3410_v44, %v2647_v34  ;;  %v3451_v27 = vpop.f32.mrf.mxu1 }
 0x32c   :  { %v3412_v60 = vpop.f32.mrf.mxu0 }
 0x32d   :  { %v3452_v47 = vadd.f32 %v3451_v27, %v3411_v54  ;;  %v3453_v55 = vpop.f32.mrf.mxu1  ;;  %v3458_v6 = vmax.f32 %v3450_v53, 0.0 }
 0x32e   :  { %v3413_v19 = vpop.f32.mrf.mxu0 }
 0x32f   :  { %v3459_v56 = vmax.f32 %v3452_v47, 0.0  ;;  %v3454_v49 = vpop.f32.mrf.mxu1  ;;  %v3462_v61 = vpack.c.bf16 %v3458_v6, %v3458_v6 }
 0x331   :  { %v3463_v59 = vpack.c.bf16 %v3459_v56, %v3459_v56 }
 0x333   :  { %4135 = vmatprep.mubr.bf16.mxu1 %v3463_v59 }
 0x334   :  { %4136 = vmatmul.mubr.bf16.vlgmr.msra.gmra.mxu1 %v3462_v61 }
 0x348   :  { %v4683_v33 = vpop.f32.mrf.mxu0 }
 0x34a   :  { %v4684_v35 = vpop.f32.mrf.mxu0 }
 0x34b   :  { %v4685_v5 = vadd.f32 %v4684_v35, %v4683_v33 }
 0x34c   :  { %v4686_v62 = vpop.f32.mrf.mxu0 }
 0x34d   :  { %v4018_v63 = vadd.f32 %v4685_v5, %v4602_v2 }
 0x34e   :  { %v4687_v1 = vpop.f32.mrf.mxu0 }
 0x374   :  { %v4705_v36 = vpop.f32.mrf.mxu1 }
 0x376   :  { %v4706_v38 = vpop.f32.mrf.mxu1 }
 0x377   :  { %v4707_v7 = vadd.f32 %v4706_v38, %v4705_v36 }
 0x378   :  { %v4708_v0 = vpop.f32.mrf.mxu1 }
 0x379   :  { %v4058_v8 = vadd.f32 %v4707_v7, %v4018_v63 }
 0x37a   :  { %v4709_v24 = vpop.f32.mrf.mxu1 }
 0x3b4   :  { %v4727_v9 = vpop.f32.mrf.mxu0 }
 0x3b6   :  { %v4728_v10 = vpop.f32.mrf.mxu0 }
 0x3b7   :  { %v4729_v11 = vadd.f32 %v4728_v10, %v4727_v9 }
 0x3b8   :  { %v4730_v12 = vpop.f32.mrf.mxu0 }
 0x3b9   :  { %v4098_v13 = vadd.f32 %v4729_v11, %v4058_v8 }
 0x3ba   :  { %v4731_v39 = vpop.f32.mrf.mxu0 }
 0x3f4   :  { %v4749_v14 = vpop.f32.mrf.mxu1 }
 0x3f6   :  { %v4750_v3 = vpop.f32.mrf.mxu1 }
 0x3f7   :  { %v4751_v15 = vadd.f32 %v4750_v3, %v4749_v14 }
 0x3f8   :  { %v4752_v29 = vpop.f32.mrf.mxu1 }
 0x3f9   :  { %v4138_v58 = vadd.f32 %v4751_v15, %v4098_v13 }
 0x3fa   :  { %v4753_v16 = vpop.f32.mrf.mxu1 }
 0x3fb   :  { %4143 = vst [vmem:[%s5876_s9] sm:$0xff] %v4138_v58 }
 0x3fc   :  { %4184 = vsyncpa [#allocation3], 1 }
 0x3fd   :  { %4185 = vsyncpa [#allocation5], 1 }
 0x3fe   :  { %4186 = vsyncpa [#allocation8], 1 }
 0x3ff   :  { %4187 = vsyncpa [#allocation11], 1 }

</bundles_post_ra>
